<compile_context>
chip_gen: v7x
topology: tpu7x:2x2x1
jax: 0.10.0
libtpu: 0.0.40
codegen_flags: <defaults>
</compile_context>

<pallas_src>
import functools
import math

import jax
import jax.numpy as jnp
import numpy as np
from jax.experimental import pallas as pl
from jax.experimental.pallas import tpu as pltpu

KW = 400      # first conv kernel width
HOP = 160     # hann smoothing stride
HPAD = 350    # hann smoothing padding
LANE = 128


def _round_up(a, b):
    return -(-a // b) * b


def _cdiv(a, b):
    return -(-a // b)


# ----------------------------------------------------------------------------
# Kernel A: 400-tap conv (packed-Toeplitz matmul) + |.|^2 pair reduction.
# ----------------------------------------------------------------------------
def _conv_power_kernel(x_ref, wre_ref, wim_ref, bre_ref, bim_ref, o_ref, *, P):
    # x_ref  : (1, n_xblk, 128)  raw signal, blocked into 128-sample rows (resident)
    # wre/wim: (Kp, P*D)         packed conv weights: col q*D+d <-> (time offset q, chan d)
    # bre/bim: (1, P*D)          conv bias tiled over the P time offsets
    # o_ref  : (1, G, P*D)       power for G output-time groups (P times each)
    Kp = wre_ref.shape[0]
    nb = Kp // LANE
    G = o_ref.shape[1]
    R = LANE // P                # lane-offset residues per 128-sample block
    GR = G // R                  # rows per residue in this step
    nwin = nb if R == 1 else nb + 1

    blk0 = pl.multiple_of(pl.program_id(1) * GR, 8)
    xb = x_ref[0, pl.ds(blk0, GR + nwin - 1), :]                 # (GR+nwin-1, 128)
    # wide[m, 128*jb + jl] = x[128*(blk0+m+jb) + jl]
    wide = jnp.concatenate([xb[j:j + GR, :] for j in range(nwin)], axis=1)
    if R > 1:
        # piece r, row m  ->  window starting at sample 128*(blk0+m) + P*r
        lhs = jnp.concatenate([wide[:, P * r: P * r + Kp] for r in range(R)],
                              axis=0)                            # (G, Kp)
    else:
        lhs = wide                                               # (G, Kp)

    g_re = jnp.dot(lhs, wre_ref[...], preferred_element_type=jnp.float32) + bre_ref[...]
    g_im = jnp.dot(lhs, wim_ref[...], preferred_element_type=jnp.float32) + bim_ref[...]
    o_ref[0] = (g_re * g_re + g_im * g_im).astype(o_ref.dtype)   # lane-dense store


# ----------------------------------------------------------------------------
# Kernel B: Hann smoothing (banded matmul) + log(1+|x|) + InstanceNorm1d.
# ----------------------------------------------------------------------------
def _smooth_lognorm_kernel(pw_ref, ht_ref, o_ref, *, m_valid, eps):
    # pw_ref: (RB, L1p)   power rows (batch*channel folded), time on lanes
    # ht_ref: (L1p, Mp)   banded Hann matrix (zero outside valid region)
    # o_ref : (RB, Mp)
    s = jnp.dot(pw_ref[...], ht_ref[...], preferred_element_type=jnp.float32)
    y = jnp.log(1.0 + jnp.abs(s))

    mpad = y.shape[1]
    midx = jax.lax.broadcasted_iota(jnp.int32, (1, mpad), 1)
    mask = (midx < m_valid).astype(jnp.float32)
    inv_m = 1.0 / float(m_valid)

    mean = jnp.sum(y * mask, axis=1, keepdims=True) * inv_m
    diff = (y - mean) * mask
    var = jnp.sum(diff * diff, axis=1, keepdims=True) * inv_m
    o_ref[...] = (diff * jax.lax.rsqrt(var + eps)).astype(o_ref.dtype)


# ----------------------------------------------------------------------------
# One-time constant preparation (weight layout expansion, banded Hann matrix).
# Done OUTSIDE the per-forward path so no per-call transposes/casts remain.
# ----------------------------------------------------------------------------
def prepare_lfb_constants(conv_w, conv_b, han, L, dim_encoded, max_rows_per_step=256):
    D = dim_encoded
    assert L >= KW, "sequence must be at least one conv window"
    L1 = L - (KW - 1)

    # P = output times packed per lane group (P*D lanes, lane-dense, P | 128).
    g = math.gcd(D, LANE)
    P = max(LANE // g, 8)                  # keep residue count R = 128/P bounded
    while P * D < 256 and P < LANE:
        P *= 2
    R = LANE // P
    Kp = _round_up(KW + P - 1, LANE)       # padded contraction width
    nb = Kp // LANE

    # Grid over output-time groups: S steps of G rows (G multiple of 8*R).
    Gtot_raw = _cdiv(L1, P)
    S = _cdiv(Gtot_raw, max_rows_per_step)
    G = _round_up(_cdiv(Gtot_raw, S), 8 * R)
    Gtot = S * G
    GR = G // R
    n_tblk = Gtot // R                     # 128-sample output blocks (= S * GR)
    L1p = n_tblk * LANE
    n_xblk = n_tblk + nb                   # raw-signal blocks incl. halo
    Lxp = n_xblk * LANE

    M = (L1 + 2 * HPAD - KW) // HOP + 1
    Mp = max(LANE, _round_up(M, LANE))

    w = np.asarray(conv_w, np.float32).reshape(2 * D, KW)
    b = np.asarray(conv_b, np.float32).reshape(2 * D)
    hanv = np.asarray(han, np.float32).reshape(KW)

    # Packed-Toeplitz expansion: rhs[j, q*D + d] = w[c, j - q] for 0 <= j-q < 400.
    jj = np.arange(Kp)[:, None]
    qq = np.arange(P)[None, :]
    kk = jj - qq                                                # (Kp, P)
    valid = ((kk >= 0) & (kk < KW)).astype(np.float32)
    kc = np.clip(kk, 0, KW - 1)

    def expand(w_half):                                          # (D, 400) -> (Kp, P*D)
        wt = w_half[:, kc] * valid[None, :, :]                   # (D, Kp, P)
        return np.ascontiguousarray(wt.transpose(1, 2, 0)).reshape(Kp, P * D)

    wt_re = expand(w[0::2])     # channels 2d   (pair index 0 in the .view)
    wt_im = expand(w[1::2])     # channels 2d+1 (pair index 1)
    b_re = np.tile(b[0::2], P)[None, :].astype(np.float32)       # (1, P*D)
    b_im = np.tile(b[1::2], P)[None, :].astype(np.float32)

    # Banded Hann smoothing matrix: HT[t, m] = han[t + 350 - 160*m] where valid;
    # rows t >= L1 and columns m >= M are zero so padded power/frames never leak.
    t = np.arange(L1p)[:, None]
    m = np.arange(Mp)[None, :]
    kh = t + HPAD - HOP * m
    vh = (kh >= 0) & (kh < KW) & (t < L1) & (m < M)
    ht = np.where(vh, hanv[np.clip(kh, 0, KW - 1)], 0.0).astype(np.float32)

    return dict(
        D=D, P=P, R=R, Kp=Kp, G=G, S=S, GR=GR, Gtot=Gtot,
        n_tblk=n_tblk, n_xblk=n_xblk, L=L, L1=L1, L1p=L1p, Lxp=Lxp, M=M, Mp=Mp,
        wt_re=jnp.asarray(wt_re), wt_im=jnp.asarray(wt_im),
        b_re=jnp.asarray(b_re), b_im=jnp.asarray(b_im),
        ht=jnp.asarray(ht),
    )


# ----------------------------------------------------------------------------
# LFBEnconder forward (normalize=True path of the module).
# ----------------------------------------------------------------------------
def lfb_forward(x, consts):
    """x: (N, 1, L) float -> (N, dimEncoded, M)."""
    D, P, R = consts["D"], consts["P"], consts["R"]
    G, S, GR = consts["G"], consts["S"], consts["GR"]
    Gtot, Kp = consts["Gtot"], consts["Kp"]
    n_xblk, Lxp, L = consts["n_xblk"], consts["Lxp"], consts["L"]
    L1p, M, Mp = consts["L1p"], consts["M"], consts["Mp"]
    N = x.shape[0]
    assert x.shape[1] == 1 and x.shape[2] == L

    xp = jnp.pad(x.reshape(N, L).astype(jnp.float32), ((0, 0), (0, Lxp - L)))
    xp = xp.reshape(N, n_xblk, LANE)

    power = pl.pallas_call(
        functools.partial(_conv_power_kernel, P=P),
        out_shape=jax.ShapeDtypeStruct((N, Gtot, P * D), jnp.float32),
        grid_spec=pltpu.PrefetchScalarGridSpec(
            num_scalar_prefetch=0,
            grid=(N, S),
            in_specs=[
                pl.BlockSpec((1, n_xblk, LANE), lambda n, s: (n, 0, 0)),
                pl.BlockSpec((Kp, P * D), lambda n, s: (0, 0)),
                pl.BlockSpec((Kp, P * D), lambda n, s: (0, 0)),
                pl.BlockSpec((1, P * D), lambda n, s: (0, 0)),
                pl.BlockSpec((1, P * D), lambda n, s: (0, 0)),
            ],
            out_specs=pl.BlockSpec((1, G, P * D), lambda n, s: (n, s, 0)),
        ),
        compiler_params=pltpu.CompilerParams(
            dimension_semantics=("parallel", "parallel"),
            vmem_limit_bytes=48 * 1024 * 1024),
    )(xp, consts["wt_re"], consts["wt_im"], consts["b_re"], consts["b_im"])

    # Layout plumbing only: within a step, row i = r*GR + m and column q*D + d
    # hold power for channel d at time 128*(s*GR + m) + P*r + q.  Undo the
    # packing with a plain XLA reshape/transpose (tiny tensor) so the smoothing
    # matmul contracts over time.
    pw = (power.reshape(N, S, R, GR, P, D)
               .transpose(0, 5, 1, 3, 2, 4)
               .reshape(N, D, L1p))

    # Fold batch x channels into the matmul rows of the smoothing kernel.
    rows = N * D
    ht_bytes = L1p * Mp * 4
    budget = 24 * 1024 * 1024
    rb_cap = max(8, (budget - ht_bytes) // (2 * L1p * 4)) if budget > ht_bytes else 8
    RB = int(min(_round_up(rows, 8), 128, rb_cap))
    RB = max(8, (RB // 8) * 8)
    Rp = _round_up(rows, RB)

    pw2 = pw.reshape(rows, L1p)
    if Rp > rows:
        pw2 = jnp.pad(pw2, ((0, Rp - rows), (0, 0)))

    out_pad = pl.pallas_call(
        functools.partial(_smooth_lognorm_kernel, m_valid=M, eps=1e-5),
        out_shape=jax.ShapeDtypeStruct((Rp, Mp), jnp.float32),
        grid_spec=pltpu.PrefetchScalarGridSpec(
            num_scalar_prefetch=0,
            grid=(Rp // RB,),
            in_specs=[
                pl.BlockSpec((RB, L1p), lambda i: (i, 0)),
                pl.BlockSpec((L1p, Mp), lambda i: (0, 0)),
            ],
            out_specs=pl.BlockSpec((RB, Mp), lambda i: (i, 0)),
        ),
        compiler_params=pltpu.CompilerParams(
            dimension_semantics=("parallel",),
            vmem_limit_bytes=48 * 1024 * 1024),
    )(pw2, consts["ht"])

    return out_pad[:rows, :M].reshape(N, D, M)


# ----------------------------------------------------------------------------
# Pure-JAX reference (faithful to the PyTorch module) for validation.
# ----------------------------------------------------------------------------
def lfb_reference(x, conv_w, conv_b, han, dim_encoded, eps=1e-5):
    N = x.shape[0]
    D = dim_encoded
    c = jax.lax.conv_general_dilated(
        x.astype(jnp.float32),
        jnp.asarray(conv_w, jnp.float32).reshape(2 * D, 1, KW),
        window_strides=(1,), padding="VALID",
        dimension_numbers=("NCH", "OIH", "NCH"),
        precision=jax.lax.Precision.HIGHEST)
    c = c + jnp.asarray(conv_b, jnp.float32)[None, :, None]
    c = c.reshape(N, D, 2, -1)
    p = c[:, :, 0, :] ** 2 + c[:, :, 1, :] ** 2
    p = p.reshape(N * D, 1, -1)
    s = jax.lax.conv_general_dilated(
        p, jnp.asarray(han, jnp.float32).reshape(1, 1, KW),
        window_strides=(HOP,), padding=[(HPAD, HPAD)],
        dimension_numbers=("NCH", "OIH", "NCH"),
        precision=jax.lax.Precision.HIGHEST)
    s = s.reshape(N, D, -1)
    y = jnp.log(1.0 + jnp.abs(s))
    mean = jnp.mean(y, axis=2, keepdims=True)
    var = jnp.var(y, axis=2, keepdims=True)      # biased, like InstanceNorm1d
    return (y - mean) / jnp.sqrt(var + eps)


if __name__ == "__main__":
    # Small shapes consistent with the module: x is (N, 1, L), L >= 400.
    N, L = 2, 2000
    dimEncoded = 16

    key = jax.random.PRNGKey(0)
    kx, kw, kb = jax.random.split(key, 3)
    x = jax.random.normal(kx, (N, 1, L), jnp.float32)

    bound = 1.0 / float(np.sqrt(KW))
    conv_w = jax.random.uniform(kw, (2 * dimEncoded, KW), jnp.float32, -bound, bound)
    conv_b = jax.random.uniform(kb, (2 * dimEncoded,), jnp.float32, -bound, bound)
    # torch.hann_window(400) (periodic) = 0.5 * (1 - cos(2*pi*n/400))
    han = jnp.asarray(0.5 * (1.0 - np.cos(2.0 * np.pi * np.arange(KW) / KW)), jnp.float32)

    consts = prepare_lfb_constants(conv_w, conv_b, han, L, dimEncoded)

    out = jax.block_until_ready(lfb_forward(x, consts))
    ref = jax.block_until_ready(lfb_reference(x, conv_w, conv_b, han, dimEncoded))

    assert out.shape == ref.shape == (N, dimEncoded, consts["M"]), (out.shape, ref.shape)
    np.testing.assert_allclose(np.asarray(out), np.asarray(ref), rtol=2e-2, atol=2e-2)

    print("KERNEL_OK")
</pallas_src>

<mosaic_0001>
module attributes {stable_mosaic.version = 11 : i64} {
  func.func @_conv_power_kernel(%arg0: i32, %arg1: i32, %arg2: memref<1x20x128xf32, #tpu.memory_space<vmem>>, %arg3: memref<512x256xf32, #tpu.memory_space<vmem>>, %arg4: memref<512x256xf32, #tpu.memory_space<vmem>>, %arg5: memref<1x256xf32, #tpu.memory_space<vmem>>, %arg6: memref<1x256xf32, #tpu.memory_space<vmem>>, %arg7: memref<1x128x256xf32, #tpu.memory_space<vmem>>) attributes {dimension_semantics = [#tpu.dimension_semantics<parallel>, #tpu.dimension_semantics<parallel>], iteration_bounds = array<i64: 2, 1>, scalar_prefetch = 0 : i64, scratch_operands = 0 : i64, tpu.core_type = #tpu.core_type<tc>, window_params = [{transform_indices = @transform_0, window_bounds = array<i64: 1, 20, 128>}, {pipeline_mode = #tpu.pipeline_mode<synchronous>, transform_indices = @transform_1, window_bounds = array<i64: 512, 256>}, {pipeline_mode = #tpu.pipeline_mode<synchronous>, transform_indices = @transform_2, window_bounds = array<i64: 512, 256>}, {pipeline_mode = #tpu.pipeline_mode<synchronous>, transform_indices = @transform_3, window_bounds = array<i64: 1, 256>}, {pipeline_mode = #tpu.pipeline_mode<synchronous>, transform_indices = @transform_4, window_bounds = array<i64: 1, 256>}, {transform_indices = @transform_5, window_bounds = array<i64: 1, 128, 256>}]} {
    %c16_i32 = arith.constant 16 : i32
    %0 = arith.muli %arg1, %c16_i32 : i32
    %1 = tpu.assume_multiple %0, 8 : i32
    %c0 = arith.constant 0 : index
    %2 = arith.index_cast %1 : i32 to index
    %c0_0 = arith.constant 0 : index
    %3 = vector.load %arg2[%c0, %2, %c0_0] : memref<1x20x128xf32, #tpu.memory_space<vmem>>, vector<1x20x128xf32>
    %4 = vector.shape_cast %3 : vector<1x20x128xf32> to vector<20x128xf32>
    %5 = vector.extract_strided_slice %4 {offsets = [0, 0], sizes = [16, 128], strides = [1, 1]} : vector<20x128xf32> to vector<16x128xf32>
    %6 = vector.extract_strided_slice %4 {offsets = [1, 0], sizes = [16, 128], strides = [1, 1]} : vector<20x128xf32> to vector<16x128xf32>
    %7 = vector.extract_strided_slice %4 {offsets = [2, 0], sizes = [16, 128], strides = [1, 1]} : vector<20x128xf32> to vector<16x128xf32>
    %8 = vector.extract_strided_slice %4 {offsets = [3, 0], sizes = [16, 128], strides = [1, 1]} : vector<20x128xf32> to vector<16x128xf32>
    %9 = vector.extract_strided_slice %4 {offsets = [4, 0], sizes = [16, 128], strides = [1, 1]} : vector<20x128xf32> to vector<16x128xf32>
    %10 = tpu.concatenate %5, %6, %7, %8, %9 in 1 : vector<16x128xf32>, vector<16x128xf32>, vector<16x128xf32>, vector<16x128xf32>, vector<16x128xf32> -> vector<16x640xf32>
    %11 = vector.extract_strided_slice %10 {offsets = [0, 0], sizes = [16, 512], strides = [1, 1]} : vector<16x640xf32> to vector<16x512xf32>
    %12 = vector.extract_strided_slice %10 {offsets = [0, 16], sizes = [16, 512], strides = [1, 1]} : vector<16x640xf32> to vector<16x512xf32>
    %13 = vector.extract_strided_slice %10 {offsets = [0, 32], sizes = [16, 512], strides = [1, 1]} : vector<16x640xf32> to vector<16x512xf32>
    %14 = vector.extract_strided_slice %10 {offsets = [0, 48], sizes = [16, 512], strides = [1, 1]} : vector<16x640xf32> to vector<16x512xf32>
    %15 = vector.extract_strided_slice %10 {offsets = [0, 64], sizes = [16, 512], strides = [1, 1]} : vector<16x640xf32> to vector<16x512xf32>
    %16 = vector.extract_strided_slice %10 {offsets = [0, 80], sizes = [16, 512], strides = [1, 1]} : vector<16x640xf32> to vector<16x512xf32>
    %17 = vector.extract_strided_slice %10 {offsets = [0, 96], sizes = [16, 512], strides = [1, 1]} : vector<16x640xf32> to vector<16x512xf32>
    %18 = vector.extract_strided_slice %10 {offsets = [0, 112], sizes = [16, 512], strides = [1, 1]} : vector<16x640xf32> to vector<16x512xf32>
    %19 = tpu.concatenate %11, %12, %13, %14, %15, %16, %17, %18 in 0 : vector<16x512xf32>, vector<16x512xf32>, vector<16x512xf32>, vector<16x512xf32>, vector<16x512xf32>, vector<16x512xf32>, vector<16x512xf32>, vector<16x512xf32> -> vector<128x512xf32>
    %c0_1 = arith.constant 0 : index
    %c0_2 = arith.constant 0 : index
    %20 = vector.load %arg3[%c0_1, %c0_2] : memref<512x256xf32, #tpu.memory_space<vmem>>, vector<512x256xf32>
    %cst = arith.constant dense<0.000000e+00> : vector<128x256xf32>
    %21 = tpu.matmul %19, %20, %cst {dimension_numbers = #tpu.dot_dimension_numbers<[1], [0], [0], [1], [0, 0, 1, 1], [], []>} : vector<128x512xf32>, vector<512x256xf32>, vector<128x256xf32> -> vector<128x256xf32>
    %c0_3 = arith.constant 0 : index
    %c0_4 = arith.constant 0 : index
    %22 = vector.load %arg5[%c0_3, %c0_4] : memref<1x256xf32, #tpu.memory_space<vmem>>, vector<1x256xf32>
    %23 = vector.broadcast %22 : vector<1x256xf32> to vector<128x256xf32>
    %24 = arith.addf %21, %23 : vector<128x256xf32>
    %c0_5 = arith.constant 0 : index
    %c0_6 = arith.constant 0 : index
    %25 = vector.load %arg4[%c0_5, %c0_6] : memref<512x256xf32, #tpu.memory_space<vmem>>, vector<512x256xf32>
    %cst_7 = arith.constant dense<0.000000e+00> : vector<128x256xf32>
    %26 = tpu.matmul %19, %25, %cst_7 {dimension_numbers = #tpu.dot_dimension_numbers<[1], [0], [0], [1], [0, 0, 1, 1], [], []>} : vector<128x512xf32>, vector<512x256xf32>, vector<128x256xf32> -> vector<128x256xf32>
    %c0_8 = arith.constant 0 : index
    %c0_9 = arith.constant 0 : index
    %27 = vector.load %arg6[%c0_8, %c0_9] : memref<1x256xf32, #tpu.memory_space<vmem>>, vector<1x256xf32>
    %28 = vector.broadcast %27 : vector<1x256xf32> to vector<128x256xf32>
    %29 = arith.addf %26, %28 : vector<128x256xf32>
    %30 = arith.mulf %24, %24 : vector<128x256xf32>
    %31 = arith.mulf %29, %29 : vector<128x256xf32>
    %32 = arith.addf %30, %31 : vector<128x256xf32>
    %c0_10 = arith.constant 0 : index
    %c0_11 = arith.constant 0 : index
    %c0_12 = arith.constant 0 : index
    %33 = vector.load %arg7[%c0_10, %c0_11, %c0_12] : memref<1x128x256xf32, #tpu.memory_space<vmem>>, vector<1x128x256xf32>
    %34 = vector.shape_cast %33 : vector<1x128x256xf32> to vector<128x256xf32>
    %35 = vector.shape_cast %32 : vector<128x256xf32> to vector<1x128x256xf32>
    tpu.vector_store %arg7[%c0_10, %c0_11, %c0_12], %35 {strides = array<i32>} : memref<1x128x256xf32, #tpu.memory_space<vmem>>, vector<1x128x256xf32>,
    return
  }
  func.func @transform_0(%arg0: i32, %arg1: i32) -> (i32, i32, i32) {
    %c0_i32 = arith.constant 0 : i32
    %c0_i32_0 = arith.constant 0 : i32
    %c0_i32_1 = arith.constant 0 : i32
    return %arg0, %c0_i32, %c0_i32_0 : i32, i32, i32
  }
  func.func @transform_1(%arg0: i32, %arg1: i32) -> (i32, i32) {
    %c0_i32 = arith.constant 0 : i32
    %c0_i32_0 = arith.constant 0 : i32
    %c0_i32_1 = arith.constant 0 : i32
    return %c0_i32, %c0_i32_0 : i32, i32
  }
  func.func @transform_2(%arg0: i32, %arg1: i32) -> (i32, i32) {
    %c0_i32 = arith.constant 0 : i32
    %c0_i32_0 = arith.constant 0 : i32
    %c0_i32_1 = arith.constant 0 : i32
    return %c0_i32, %c0_i32_0 : i32, i32
  }
  func.func @transform_3(%arg0: i32, %arg1: i32) -> (i32, i32) {
    %c0_i32 = arith.constant 0 : i32
    %c0_i32_0 = arith.constant 0 : i32
    %c0_i32_1 = arith.constant 0 : i32
    return %c0_i32, %c0_i32_0 : i32, i32
  }
  func.func @transform_4(%arg0: i32, %arg1: i32) -> (i32, i32) {
    %c0_i32 = arith.constant 0 : i32
    %c0_i32_0 = arith.constant 0 : i32
    %c0_i32_1 = arith.constant 0 : i32
    return %c0_i32, %c0_i32_0 : i32, i32
  }
  func.func @transform_5(%arg0: i32, %arg1: i32) -> (i32, i32, i32) {
    %c0_i32 = arith.constant 0 : i32
    %c0_i32_0 = arith.constant 0 : i32
    return %arg0, %arg1, %c0_i32 : i32, i32, i32
  }
}

</mosaic_0001>

<bundles_post_ra>
// kernel: tpu_custom_call.1
= control target key start
LH: loop header
LB: loop body
LE: loop exit
PB: predicated region body
PF: predicated region fallthrough
CT: control target
= control target key end

     0   :  { %10 = vsyncpa [#allocation3], 0  ;;  %s3366_s0 = inlined_call_operand.vmem [shape: f32[2,20,128], index: 0, kind: input, shape index: {}]   ;;  %s3367_s1 = inlined_call_operand.hbm [shape: f32[512,256], index: 1, kind: input, shape index: {}]   ;;  %s3368_s2 = inlined_call_operand.hbm [shape: f32[512,256], index: 2, kind: input, shape index: {}]   ;;  %s3369_s3 = inlined_call_operand.vmem [shape: f32[1,256], index: 3, kind: input, shape index: {}]   ;;  %s3370_s4 = inlined_call_operand.vmem [shape: f32[1,256], index: 4, kind: input, shape index: {}]   ;;  %s3371_s5 = inlined_call_operand.hbm [shape: f32[2,128,256], index: 5, kind: output, shape index: {}]  }
   0x1   :  { %11 = vsyncpa [#allocation6], 0 }
   0x2   :  { %12 = vsyncpa [#allocation4], 0 }
   0x3   :  { %14 = vsyncpa [#allocation4 + $0x1], 0  ;;  %s2581_s18 = smov 0   ;;  %s2583_s19 = smov 0  }
   0x4   :  { %s2585_s20 = smov 0   ;;  %s2587_s21 = smov 0  }
   0x5   :  { %s2589_s22 = smov 0   ;;  %s2591_s23 = smov 0  }
   0x6 LB: > { %s1731_s24 = sadd.s32 4294967295, %s2536_s23   ;;  %s1732_s25 = sadd.s32 4294967294, %s2536_s23   ;;  %s2536_s23 = sphi %s2591_s23, %s20_s23   ;;  %s2532_s22 = sphi %s2589_s22, %s3392_s22   ;;  %s2528_s21 = sphi %s2587_s21, %s3391_s21   ;;  %s2524_s20 = sphi %s2585_s20, %s3390_s20   ;;  %s2520_s19 = sphi %s2583_s19, %s3389_s19   ;;  %s2516_s18 = sphi %s2581_s18, %s3388_s18  }
   0x7   : > { %s32_s26 = sadd.s32 1, %s2532_s22  ;;  %s151_s27 = sadd.s32 1, %s2524_s20 }
   0x8   : > { %p34_p0 = scmp.ge.s32.totalorder %s32_s26, 2  ;;  %p161_p1 = scmp.ne.s32.totalorder %s2524_s20, %s2520_s19 }
   0x9   : > { %p162_p2 = scmp.eq.s32.totalorder %s1731_s24, 1  ;;  %p167_p3 = scmp.ne.s32.totalorder %s2520_s19, %s2516_s18 }
   0xa   : > { %s3394_s26 = smov (%p34_p0, %s32_s26), 0  ;;  %p168_p5 = scmp.eq.s32.totalorder %s1732_s25, 1 }
   0xb   : > { %3377 = sst [smem:[#allocation11_spill]] %s3394_s26  ;;  %p2621_p4 = por %p162_p2, %p161_p1 }
   0xc   : > { %s146_s29 = ssub.s32 %s2532_s22, %s3394_s26  ;;  %p1733_p6 = scmp.ge.s32.totalorder %s2536_s23, 1 }
   0xd   : > { %s3378_s28 = scalar_select %p2621_p4, 1, 0 }
   0xe   : > { %p149_p7 = scmp.eq.s32.totalorder %s146_s29, 0  ;;  %p2628_p8 = por %p168_p5, %p167_p3 }
   0xf   : > { %p175_p9 = scmp.lt.s32.totalorder %s2536_s23, 3  ;;  %p2640_p11 = scmp.eq.s32.totalorder %s1731_s24, 0 }
  0x10   : > { %s3379_s30 = scalar_select %p2628_p8, 1, 0 }
  0x11   : > { %s2634_s6 = scalar_select %p149_p7, %s2524_s20, %s151_s27  }
  0x12   : > { %p2636_p10 = pnand %p1733_p6, %p175_p9  ;;  %s2538_s9 = smov [#allocation2]  }
  0x13   : > { %s3381_s8 = scalar_select %p2640_p11, 1, 0 }
  0x14   : > { %s3380_s7 = scalar_select %p2636_p10, 1, 0 }
  0x15   : > { %p2143_p12 = pneg %p2636_p10  ;;  %s187_s10 = sshll.u32 %s2538_s9, 4  ;;  %s188_s10 = int_to_ptr.vmem [resolvable:$true] %s187_s10 }
  0x16   : > { %s2539_s12 = smov [#allocation5]   ;;  %s2394_s16 = scalar_lea.hbm %s3367_s1, 16384 }
  0x17   : > { %p2648_p13 = pnand %p2640_p11, %p2143_p12  ;;  %s200_s13 = sshll.u32 %s2539_s12, 4  ;;  %s2652_s13 = int_to_ptr.vmem [resolvable:$true] %s200_s13 }
  0x18   : > { %p2395_p0 = scmp.ne.s32.totalorder %s3367_s1, %s2394_s16  ;;  %p2401_p5 = scmp.lt.u32.totalorder %s2394_s16, %s3367_s1 }
  0x19   : > { %p2396_p1 = pneg %p2648_p13 }
  0x1b   : > { %p2397_p2 = pnand %p2396_p1, %p2395_p0 }
  0x1d   : > { %p2398_p3 = pneg %p2397_p2 }
  0x1f   : > { %p2403_p6 = pnand %p2401_p5, %p2398_p3 }
  0x21   : > { %2406 = shalt.err (!%p2403_p6)
}
  0x22   : > { %s2407_s29 = scalar_lea.vmem %s188_s10, 16384  ;;  %p2415_p8 = scmp.lt.s32.totalorder %s188_s10, %s188_s10 }
  0x23   : > { %p2408_p7 = scmp.ne.s32.totalorder %s188_s10, %s2407_s29  ;;  %p2416_p4 = scmp.lt.s32.totalorder %s2407_s29, %s2407_s29 }
  0x25   : > { %p2410_p9 = pnand %p2408_p7, %p2396_p1  ;;  %p2417_p11 = por %p2416_p4, %p2415_p8 }
  0x27   : > { %p2411_p12 = pneg %p2410_p9 }
  0x29   : > { %p2418_p10 = pnand %p2417_p11, %p2411_p12 }
  0x2b   : > { %2421 = shalt.err (!%p2418_p10)
}
  0x2c   : > { %s2540_s9 = smov 256   ;;  %s2541_s12 = smov 16  }
  0x2d   : > { %2146 = dma.hbm_to_vmem [thread:$0]  (!%p2648_p13), %s3367_s1, 16384, %s188_s10, [#allocation3], %s2540_s9, %s2540_s9, %s2541_s12  }
  0x2e   : > { %s2422_s24 = scalar_lea.hbm %s3368_s2, 16384 }
  0x2f   : > { %p2423_p0 = scmp.ne.s32.totalorder %s3368_s2, %s2422_s24  ;;  %p2429_p10 = scmp.lt.u32.totalorder %s2422_s24, %s3368_s2 }
  0x31   : > { %p2425_p4 = pnand %p2423_p0, %p2396_p1 }
  0x33   : > { %p2426_p8 = pneg %p2425_p4 }
  0x35   : > { %p2431_p11 = pnand %p2429_p10, %p2426_p8 }
  0x37   : > { %2434 = shalt.err (!%p2431_p11)
}
  0x38   : > { %s2435_s10 = scalar_lea.vmem %s2652_s13, 16384  ;;  %p2443_p6 = scmp.lt.s32.totalorder %s2652_s13, %s2652_s13 }
  0x39   : > { %p2436_p2 = scmp.ne.s32.totalorder %s2652_s13, %s2435_s10  ;;  %p2444_p7 = scmp.lt.s32.totalorder %s2435_s10, %s2435_s10 }
  0x3b   : > { %p2438_p3 = pnand %p2436_p2, %p2396_p1  ;;  %p2445_p9 = por %p2444_p7, %p2443_p6 }
  0x3d   : > { %p2439_p5 = pneg %p2438_p3 }
  0x3f   : > { %p2446_p12 = pnand %p2445_p9, %p2439_p5 }
  0x41   : > { %2449 = shalt.err (!%p2446_p12)
}
  0x42   : > { %2149 = dma.hbm_to_vmem [thread:$0]  (!%p2648_p13), %s3368_s2, 16384, %s2652_s13, [#allocation6], %s2540_s9, %s2540_s9, %s2541_s12  }
  0x43   : > { %p3383_p0 = scmp.ne.s32.totalorder %s3380_s7, 0 }
  0x44   : > { %p3384_p4 = scmp.ne.s32.totalorder (!%p3383_p0), %s3381_s8, 0 }
  0x45   : > { %230 = sbr.rel (%p3383_p0) target bundleno = 565 (0x235), region = 40 }
  0x4c   : > { %2503 = dma.done.wait (%p3384_p4), [#allocation3], 16384  }
  0x4d   : > { %2505 = vsyncadd (%p3384_p4), [#allocation3], 4294950912 }
  0x4e   : > { %2507 = dma.done.wait (%p3384_p4), [#allocation6], 16384  }
  0x4f   : > { %2509 = vsyncadd (%p3384_p4), [#allocation6], 4294950912  ;;  %p262_p1 = scmp.lt.s32.totalorder %s2528_s21, 1  ;;  %vm284_vm0 = vcmask 1045504   ;;  %vm276_vm1 = vcmask 1046528   ;;  %s2542_s8 = smov 112  }
  0x50   : > { %v566_v16 = vld [vmem:[#allocation2 + $0x8] sm:$0xff]  ;;  %v568_v17 = vld [vmem:[#allocation2 + $0x18] sm:$0xff]  ;;  %v565_v20 = vld [vmem:[#allocation2] sm:$0xff]  ;;  %s2543_s15 = smov 96   ;;  %s2544_s16 = smov 80   ;;  %vm292_vm2 = vcmask 1044480  }
  0x51   : > { %s263_s11 = scalar_select %p262_p1, %s2528_s21, 1  ;;  %v1028_v18 = vld [vmem:[#allocation5 + $0x8] sm:$0xff]  ;;  %v1030_v19 = vld [vmem:[#allocation5 + $0x18] sm:$0xff]  ;;  %v567_v21 = vld [vmem:[#allocation2 + $0x10] sm:$0xff]  ;;  %v1748_v28 = vpack.c.bf16 %v568_v17, %v566_v16  ;;  %vm300_vm3 = vcmask 1043456   ;;  %vm326_vm4 = vcmask 916480  }
  0x52   : > { %v1027_v22 = vld [vmem:[#allocation5] sm:$0xff]  ;;  %v1029_v23 = vld [vmem:[#allocation5 + $0x10] sm:$0xff]  ;;  %v570_v24 = vld [vmem:[#allocation2 + $0x28] sm:$0xff]  ;;  %v1876_v29 = vpack.c.bf16 %v1030_v19, %v1028_v18  ;;  %v1750_v32 = vpack.c.bf16 %v567_v21, %v565_v20  ;;  %s2545_s17 = smov 64   ;;  %s2546_s24 = smov 48   ;;  %vm363_vm5 = vcmask 785408  }
  0x53   : > { %s2132_s13 = smul.u32 24, %s263_s11  ;;  %v572_v25 = vld [vmem:[#allocation2 + $0x38] sm:$0xff]  ;;  %v1032_v26 = vld [vmem:[#allocation5 + $0x28] sm:$0xff]  ;;  %v569_v30 = vld [vmem:[#allocation2 + $0x20] sm:$0xff]  ;;  %v1878_v33 = vpack.c.bf16 %v1029_v23, %v1027_v22  ;;  %1749 = vmatprep.subr.bf16.mxu0 %v1748_v28  ;;  %s2547_s25 = smov 32   ;;  %vm400_vm6 = vcmask 654336  }
  0x54   : > { %v1034_v27 = vld [vmem:[#allocation5 + $0x38] sm:$0xff]  ;;  %v571_v31 = vld [vmem:[#allocation2 + $0x30] sm:$0xff]  ;;  %v1031_v34 = vld [vmem:[#allocation5 + $0x20] sm:$0xff]  ;;  %1877 = vmatprep.subr.bf16.mxu1 %v1876_v29  ;;  %v1752_v37 = vpack.c.bf16 %v572_v25, %v570_v24  ;;  %1751 = vmatpush1.bf16.msra.mxu0 %v1750_v32  ;;  %s2548_s27 = smov 16   ;;  %vm437_vm7 = vcmask 523264   ;;  %vm474_vm8 = vcmask 392192  }
  0x55   : > { %s266_s12 = scalar_lea.vmem %s3366_s0, %s2132_s13  ;;  %v1033_v35 = vld [vmem:[#allocation5 + $0x30] sm:$0xff]  ;;  %v574_v36 = vld [vmem:[#allocation2 + $0x48] sm:$0xff]  ;;  %v1880_v38 = vpack.c.bf16 %v1034_v27, %v1032_v26  ;;  %v576_v39 = vld [vmem:[#allocation2 + $0x58] sm:$0xff]  ;;  %1879 = vmatpush1.bf16.msra.mxu1 %v1878_v33  ;;  %v1754_v42 = vpack.c.bf16 %v571_v31, %v569_v30  ;;  %vm511_vm9 = vcmask 261120   ;;  %vm548_vm10 = vcmask 130048   ;;  %s259_s11 = sand.u32 1, %s2520_s19  }
  0x56   : > { %v2716_v0 = vld [vmem:[%s266_s12 + $0x8] sm:$0xff]  ;;  %v2718_v1 = vld [vmem:[%s266_s12 + $0x10] sm:$0xf]  ;;  %v2720_v2 = vld [vmem:[%s266_s12] sm:$0xff]  ;;  %v1882_v43 = vpack.c.bf16 %v1033_v35, %v1031_v34  ;;  %1753 = vmatprep.subr.bf16.mxu0 %v1752_v37  ;;  %v1756_v46 = vpack.c.bf16 %v576_v39, %v574_v36  ;;  %s1740_s13 = sshll.u32 %s259_s11, 8  ;;  %s1747_s7 = sshll.u32 %s2528_s21, 12 }
  0x57   : > { %v286_v3 = vrot.slane %v2716_v0, 2  ;;  %v288_v4 = vrot.slane %v2718_v1, 2  ;;  %v277_v5 = vrot.slane %v2720_v2, 1  ;;  %v278_v6 = vrot.slane %v2716_v0, 1  ;;  %v1036_v40 = vld [vmem:[#allocation5 + $0x48] sm:$0xff]  ;;  %v1038_v41 = vld [vmem:[#allocation5 + $0x58] sm:$0xff]  ;;  %1881 = vmatprep.subr.bf16.mxu1 %v1880_v38 }
  0x58   : > { %v285_v7 = vrot.slane %v2720_v2, 2  ;;  %v280_v8 = vrot.slane %v2718_v1, 1  ;;  %v573_v44 = vld [vmem:[#allocation2 + $0x40] sm:$0xff]  ;;  %v575_v45 = vld [vmem:[#allocation2 + $0x50] sm:$0xff]  ;;  %v1884_v47 = vpack.c.bf16 %v1038_v41, %v1036_v40  ;;  %v578_v50 = vld [vmem:[#allocation2 + $0x68] sm:$0xff]  ;;  %1755 = vmatpush1.bf16.msra.mxu0 %v1754_v42  ;;  %s3218_s9 = scalar_lea.vmem [#allocation7], %s1740_s13 }
  0x59   : > { %v2728_v9 = vsel %vm284_vm0, %v286_v3, %v288_v4  ;;  %v279_v10 = vsel %vm276_vm1, %v277_v5, %v278_v6  ;;  %v1035_v48 = vld [vmem:[#allocation5 + $0x40] sm:$0xff]  ;;  %v1037_v49 = vld [vmem:[#allocation5 + $0x50] sm:$0xff]  ;;  %v580_v51 = vld [vmem:[#allocation2 + $0x78] sm:$0xff]  ;;  %v1758_v54 = vpack.c.bf16 %v575_v45, %v573_v44  ;;  %1883 = vmatpush1.bf16.msra.mxu1 %v1882_v43  ;;  %1757 = vmatprep.subr.bf16.mxu0 %v1756_v46  ;;  %s1634_s12 = sshll.u32 %s3218_s9, 4  ;;  %s3319_s21 = scalar_lea.sflag [#allocation4], %s259_s11  ;;  %s3313_s12 = int_to_ptr.vmem [resolvable:$true] %s1634_s12 }
  0x5a   : > { %v2732_v11 = vpack.i.bf16 %v2716_v0, %v2728_v9  ;;  %v2734_v12 = vsel %vm284_vm0, %v285_v7, %v286_v3  ;;  %v2736_v13 = vsel %vm276_vm1, %v278_v6, %v280_v8  ;;  %769 = vmatprep.mubr.f32.mxu0 %v279_v10  ;;  %1231 = vmatprep.mubr.f32.mxu1 %v279_v10  ;;  %v1040_v52 = vld [vmem:[#allocation5 + $0x68] sm:$0xff]  ;;  %v1042_v53 = vld [vmem:[#allocation5 + $0x78] sm:$0xff]  ;;  %v577_v56 = vld [vmem:[#allocation2 + $0x60] sm:$0xff]  ;;  %p3385_p8 = scmp.ne.s32.totalorder %s3378_s28, 0 }
  0x5b   : > { %v2739_v14 = vpack.i.bf16 %v2734_v12, %v279_v10  ;;  %v2747_v15 = vpack.i.bf16 %v2736_v13, %v2720_v2  ;;  %v1886_v55 = vpack.c.bf16 %v1037_v49, %v1035_v48  ;;  %v579_v57 = vld [vmem:[#allocation2 + $0x70] sm:$0xff]  ;;  %1885 = vmatprep.subr.bf16.mxu1 %v1884_v47  ;;  %v1760_v58 = vpack.c.bf16 %v580_v51, %v578_v50  ;;  %v1039_v60 = vld [vmem:[#allocation5 + $0x60] sm:$0xff]  ;;  %v582_v62 = vld [vmem:[#allocation2 + $0x88] sm:$0xff] }
  0x5c   : > { %2230 = vrot.lane.b32.xlu1 %v2732_v11, %s2542_s8  ;;  %v1888_v59 = vpack.c.bf16 %v1042_v53, %v1040_v52  ;;  %v1041_v61 = vld [vmem:[#allocation5 + $0x70] sm:$0xff]  ;;  %v584_v63 = vld [vmem:[#allocation2 + $0x98] sm:$0xff]  ;;  %v1044_v3 = vld [vmem:[#allocation5 + $0x88] sm:$0xff]  ;;  %1759 = vmatpush1.bf16.msra.mxu0 %v1758_v54  ;;  %v1762_v5 = vpack.c.bf16 %v579_v57, %v577_v56  ;;  %v293_v47 = vrot.slane %v2720_v2, 3  ;;  %v294_v48 = vrot.slane %v2716_v0, 3 }
  0x5d   : > { %2220 = vrot.lane.b32.xlu0 %v2739_v14, %s2542_s8  ;;  %v1046_v4 = vld [vmem:[#allocation5 + $0x98] sm:$0xff]  ;;  %1887 = vmatpush1.bf16.msra.mxu1 %v1886_v55  ;;  %v1890_v6 = vpack.c.bf16 %v1041_v61, %v1039_v60  ;;  %v581_v7 = vld [vmem:[#allocation2 + $0x80] sm:$0xff]  ;;  %v583_v8 = vld [vmem:[#allocation2 + $0x90] sm:$0xff]  ;;  %v1764_v10 = vpack.c.bf16 %v584_v63, %v582_v62  ;;  %v301_v50 = vrot.slane %v2720_v2, 4  ;;  %v302_v51 = vrot.slane %v2716_v0, 4 }
  0x5e   : > { %1761 = vmatprep.subr.bf16.mxu0 %v1760_v58  ;;  %1889 = vmatprep.subr.bf16.mxu1 %v1888_v59  ;;  %v1892_v16 = vpack.c.bf16 %v1046_v4, %v1044_v3  ;;  %v1043_v17 = vld [vmem:[#allocation5 + $0x80] sm:$0xff]  ;;  %v1045_v18 = vld [vmem:[#allocation5 + $0x90] sm:$0xff]  ;;  %v586_v19 = vld [vmem:[#allocation2 + $0xa8] sm:$0xff]  ;;  %v1766_v23 = vpack.c.bf16 %v583_v8, %v581_v7  ;;  %v2786_v3 = vsel %vm292_vm2, %v293_v47, %v294_v48 }
  0x5f   : > { %v588_v20 = vld [vmem:[#allocation2 + $0xb8] sm:$0xff]  ;;  %v1048_v21 = vld [vmem:[#allocation5 + $0xa8] sm:$0xff]  ;;  %v1894_v24 = vpack.c.bf16 %v1045_v18, %v1043_v17  ;;  %v585_v25 = vld [vmem:[#allocation2 + $0xa0] sm:$0xff]  ;;  %v303_v4 = vsel %vm300_vm3, %v301_v50, %v302_v51 }
  0x60   : > { %2235 = vrot.lane.b32.xlu1 %v2739_v14, %s2543_s15  ;;  %v1050_v22 = vld [vmem:[#allocation5 + $0xb8] sm:$0xff]  ;;  %1763 = vmatpush1.bf16.msra.mxu0 %v1762_v5  ;;  %v587_v26 = vld [vmem:[#allocation2 + $0xb0] sm:$0xff]  ;;  %v1768_v27 = vpack.c.bf16 %v588_v20, %v586_v19  ;;  %v1047_v29 = vld [vmem:[#allocation5 + $0xa0] sm:$0xff]  ;;  %v296_v5 = vrot.slane %v2718_v1, 3 }
  0x61   : > { %2225 = vrot.lane.b32.xlu0 %v2747_v15, %s2542_s8  ;;  %1891 = vmatpush1.bf16.msra.mxu1 %v1890_v6  ;;  %v1896_v28 = vpack.c.bf16 %v1050_v22, %v1048_v21  ;;  %v1049_v30 = vld [vmem:[#allocation5 + $0xb0] sm:$0xff]  ;;  %v590_v31 = vld [vmem:[#allocation2 + $0xc8] sm:$0xff]  ;;  %v592_v32 = vld [vmem:[#allocation2 + $0xd8] sm:$0xff]  ;;  %v1770_v35 = vpack.c.bf16 %v587_v26, %v585_v25 }
  0x62   : > { %1765 = vmatprep.subr.bf16.mxu0 %v1764_v10  ;;  %1893 = vmatprep.subr.bf16.mxu1 %v1892_v16  ;;  %v1052_v33 = vld [vmem:[#allocation5 + $0xc8] sm:$0xff]  ;;  %v1054_v34 = vld [vmem:[#allocation5 + $0xd8] sm:$0xff]  ;;  %v1898_v36 = vpack.c.bf16 %v1049_v30, %v1047_v29  ;;  %v589_v37 = vld [vmem:[#allocation2 + $0xc0] sm:$0xff]  ;;  %v1772_v39 = vpack.c.bf16 %v592_v32, %v590_v31  ;;  %v304_v10 = vrot.slane %v2718_v1, 4  ;;  %v2799_v1 = vsel %vm292_vm2, %v294_v48, %v296_v5 }
  0x63   : > { %v591_v38 = vld [vmem:[#allocation2 + $0xd0] sm:$0xff]  ;;  %v1900_v40 = vpack.c.bf16 %v1054_v34, %v1052_v33  ;;  %v1051_v41 = vld [vmem:[#allocation5 + $0xc0] sm:$0xff]  ;;  %v594_v43 = vld [vmem:[#allocation2 + $0xe8] sm:$0xff] }
  0x64   : > { %2245 = vrot.lane.b32.xlu1 %v2732_v11, %s2543_s15  ;;  %1767 = vmatpush1.bf16.msra.mxu0 %v1766_v23  ;;  %v1053_v42 = vld [vmem:[#allocation5 + $0xd0] sm:$0xff]  ;;  %v596_v44 = vld [vmem:[#allocation2 + $0xf8] sm:$0xff]  ;;  %v1056_v45 = vld [vmem:[#allocation5 + $0xe8] sm:$0xff]  ;;  %v1774_v49 = vpack.c.bf16 %v591_v38, %v589_v37  ;;  %v305_v29 = vsel %vm300_vm3, %v302_v51, %v304_v10 }
  0x65   : > { %2240 = vrot.lane.b32.xlu0 %v2747_v15, %s2543_s15  ;;  %1895 = vmatpush1.bf16.msra.mxu1 %v1894_v24  ;;  %v1058_v46 = vld [vmem:[#allocation5 + $0xf8] sm:$0xff]  ;;  %v1902_v52 = vpack.c.bf16 %v1053_v42, %v1051_v41  ;;  %v593_v53 = vld [vmem:[#allocation2 + $0xe0] sm:$0xff]  ;;  %v595_v54 = vld [vmem:[#allocation2 + $0xf0] sm:$0xff]  ;;  %v1776_v55 = vpack.c.bf16 %v596_v44, %v594_v43  ;;  %v2794_v24 = vpack.i.bf16 %v303_v4, %v2786_v3 }
  0x66   : > { %1769 = vmatprep.subr.bf16.mxu0 %v1768_v27  ;;  %1897 = vmatprep.subr.bf16.mxu1 %v1896_v28  ;;  %v1904_v56 = vpack.c.bf16 %v1058_v46, %v1056_v45  ;;  %v1055_v57 = vld [vmem:[#allocation5 + $0xe0] sm:$0xff]  ;;  %v1057_v58 = vld [vmem:[#allocation5 + $0xf0] sm:$0xff]  ;;  %v598_v59 = vld [vmem:[#allocation2 + $0x108] sm:$0xff]  ;;  %v1778_v63 = vpack.c.bf16 %v595_v54, %v593_v53  ;;  %v2807_v37 = vpack.i.bf16 %v305_v29, %v2799_v1 }
  0x67   : > { %v600_v60 = vld [vmem:[#allocation2 + $0x118] sm:$0xff]  ;;  %v1060_v61 = vld [vmem:[#allocation5 + $0x108] sm:$0xff]  ;;  %v1906_v6 = vpack.c.bf16 %v1057_v58, %v1055_v57  ;;  %v597_v7 = vld [vmem:[#allocation2 + $0x100] sm:$0xff] }
  0x68   : > { %2255 = vrot.lane.b32.xlu1 %v2747_v15, %s2544_s16  ;;  %1771 = vmatpush1.bf16.msra.mxu0 %v1770_v35  ;;  %v1062_v62 = vld [vmem:[#allocation5 + $0x118] sm:$0xff]  ;;  %v599_v8 = vld [vmem:[#allocation2 + $0x110] sm:$0xff]  ;;  %v1780_v16 = vpack.c.bf16 %v600_v60, %v598_v59  ;;  %v1059_v18 = vld [vmem:[#allocation5 + $0x100] sm:$0xff] }
  0x69   : > { %2250 = vrot.lane.b32.xlu0 %v2739_v14, %s2544_s16  ;;  %1899 = vmatpush1.bf16.msra.mxu1 %v1898_v36  ;;  %v1908_v17 = vpack.c.bf16 %v1062_v62, %v1060_v61  ;;  %v1061_v19 = vld [vmem:[#allocation5 + $0x110] sm:$0xff]  ;;  %v602_v20 = vld [vmem:[#allocation2 + $0x128] sm:$0xff]  ;;  %v604_v21 = vld [vmem:[#allocation2 + $0x138] sm:$0xff]  ;;  %v1782_v25 = vpack.c.bf16 %v599_v8, %v597_v7 }
  0x6a   : > { %1773 = vmatprep.subr.bf16.mxu0 %v1772_v39  ;;  %1901 = vmatprep.subr.bf16.mxu1 %v1900_v40  ;;  %v1064_v22 = vld [vmem:[#allocation5 + $0x128] sm:$0xff]  ;;  %v1066_v23 = vld [vmem:[#allocation5 + $0x138] sm:$0xff]  ;;  %v1910_v26 = vpack.c.bf16 %v1061_v19, %v1059_v18  ;;  %v601_v27 = vld [vmem:[#allocation2 + $0x120] sm:$0xff] }
  0x6b   : > { %v603_v28 = vld [vmem:[#allocation2 + $0x130] sm:$0xff]  ;;  %v1912_v30 = vpack.c.bf16 %v1066_v23, %v1064_v22  ;;  %v1063_v31 = vld [vmem:[#allocation5 + $0x120] sm:$0xff]  ;;  %v606_v33 = vld [vmem:[#allocation2 + $0x148] sm:$0xff] }
  0x6c   : > { %2265 = vrot.lane.b32.xlu1 %v2739_v14, %s2545_s17  ;;  %1775 = vmatpush1.bf16.msra.mxu0 %v1774_v49  ;;  %v1065_v32 = vld [vmem:[#allocation5 + $0x130] sm:$0xff]  ;;  %v608_v34 = vld [vmem:[#allocation2 + $0x158] sm:$0xff]  ;;  %v1068_v35 = vld [vmem:[#allocation5 + $0x148] sm:$0xff] }
  0x6d   : > { %2260 = vrot.lane.b32.xlu0 %v2732_v11, %s2544_s16  ;;  %1903 = vmatpush1.bf16.msra.mxu1 %v1902_v52  ;;  %v1070_v36 = vld [vmem:[#allocation5 + $0x158] sm:$0xff]  ;;  %v1914_v38 = vpack.c.bf16 %v1065_v32, %v1063_v31  ;;  %v605_v39 = vld [vmem:[#allocation2 + $0x140] sm:$0xff]  ;;  %v607_v40 = vld [vmem:[#allocation2 + $0x150] sm:$0xff]  ;;  %v1788_v41 = vpack.c.bf16 %v608_v34, %v606_v33 }
  0x6e   : > { %1777 = vmatprep.subr.bf16.mxu0 %v1776_v55  ;;  %1905 = vmatprep.subr.bf16.mxu1 %v1904_v56  ;;  %v1916_v42 = vpack.c.bf16 %v1070_v36, %v1068_v35  ;;  %v1067_v43 = vld [vmem:[#allocation5 + $0x140] sm:$0xff]  ;;  %v1069_v44 = vld [vmem:[#allocation5 + $0x150] sm:$0xff]  ;;  %v610_v45 = vld [vmem:[#allocation2 + $0x168] sm:$0xff] }
  0x6f   : > { %v612_v46 = vld [vmem:[#allocation2 + $0x178] sm:$0xff]  ;;  %v1072_v47 = vld [vmem:[#allocation5 + $0x168] sm:$0xff]  ;;  %v1918_v49 = vpack.c.bf16 %v1069_v44, %v1067_v43  ;;  %v609_v50 = vld [vmem:[#allocation2 + $0x160] sm:$0xff] }
  0x70   : > { %2275 = vrot.lane.b32.xlu1 %v2732_v11, %s2545_s17  ;;  %1779 = vmatpush1.bf16.msra.mxu0 %v1778_v63  ;;  %v1074_v48 = vld [vmem:[#allocation5 + $0x178] sm:$0xff]  ;;  %v611_v51 = vld [vmem:[#allocation2 + $0x170] sm:$0xff]  ;;  %v1792_v52 = vpack.c.bf16 %v612_v46, %v610_v45  ;;  %v1071_v54 = vld [vmem:[#allocation5 + $0x160] sm:$0xff] }
  0x71   : > { %2270 = vrot.lane.b32.xlu0 %v2747_v15, %s2545_s17  ;;  %1907 = vmatpush1.bf16.msra.mxu1 %v1906_v6  ;;  %v1920_v53 = vpack.c.bf16 %v1074_v48, %v1072_v47  ;;  %v1073_v55 = vld [vmem:[#allocation5 + $0x170] sm:$0xff]  ;;  %v614_v56 = vld [vmem:[#allocation2 + $0x188] sm:$0xff]  ;;  %v616_v57 = vld [vmem:[#allocation2 + $0x198] sm:$0xff]  ;;  %v1794_v60 = vpack.c.bf16 %v611_v51, %v609_v50 }
  0x72   : > { %1781 = vmatprep.subr.bf16.mxu0 %v1780_v16  ;;  %1909 = vmatprep.subr.bf16.mxu1 %v1908_v17  ;;  %v1076_v58 = vld [vmem:[#allocation5 + $0x188] sm:$0xff]  ;;  %v1078_v59 = vld [vmem:[#allocation5 + $0x198] sm:$0xff]  ;;  %v1922_v61 = vpack.c.bf16 %v1073_v55, %v1071_v54  ;;  %v613_v62 = vld [vmem:[#allocation2 + $0x180] sm:$0xff]  ;;  %v1796_v4 = vpack.c.bf16 %v616_v57, %v614_v56 }
  0x73   : > { %v615_v63 = vld [vmem:[#allocation2 + $0x190] sm:$0xff]  ;;  %v1924_v5 = vpack.c.bf16 %v1078_v59, %v1076_v58  ;;  %v1075_v6 = vld [vmem:[#allocation5 + $0x180] sm:$0xff]  ;;  %v618_v8 = vld [vmem:[#allocation2 + $0x1a8] sm:$0xff] }
  0x74   : > { %2285 = vrot.lane.b32.xlu1 %v2747_v15, %s2546_s24  ;;  %1783 = vmatpush1.bf16.msra.mxu0 %v1782_v25  ;;  %v1077_v7 = vld [vmem:[#allocation5 + $0x190] sm:$0xff]  ;;  %v620_v10 = vld [vmem:[#allocation2 + $0x1b8] sm:$0xff]  ;;  %v1080_v16 = vld [vmem:[#allocation5 + $0x1a8] sm:$0xff]  ;;  %v1798_v18 = vpack.c.bf16 %v615_v63, %v613_v62 }
  0x75   : > { %2280 = vrot.lane.b32.xlu0 %v2739_v14, %s2546_s24  ;;  %1911 = vmatpush1.bf16.msra.mxu1 %v1910_v26  ;;  %v1082_v17 = vld [vmem:[#allocation5 + $0x1b8] sm:$0xff]  ;;  %v1926_v19 = vpack.c.bf16 %v1077_v7, %v1075_v6  ;;  %v1800_v22 = vpack.c.bf16 %v620_v10, %v618_v8  ;;  %v1079_v25 = vld [vmem:[#allocation5 + $0x1a0] sm:$0xff]  ;;  %v1081_v26 = vld [vmem:[#allocation5 + $0x1b0] sm:$0xff] }
  0x76   : > { %1913 = vmatprep.subr.bf16.mxu1 %v1912_v30  ;;  %v1928_v23 = vpack.c.bf16 %v1082_v17, %v1080_v16  ;;  %v1084_v29 = vld [vmem:[#allocation5 + $0x1c8] sm:$0xff]  ;;  %v1930_v31 = vpack.c.bf16 %v1081_v26, %v1079_v25  ;;  %v621_v32 = vld [vmem:[#allocation2 + $0x1c0] sm:$0xff]  ;;  %v623_v33 = vld [vmem:[#allocation2 + $0x1d0] sm:$0xff] }
  0x77   : > { %v1083_v36 = vld [vmem:[#allocation5 + $0x1c0] sm:$0xff]  ;;  %v627_v45 = vld [vmem:[#allocation2 + $0x1f0] sm:$0xff]  ;;  %v632_v50 = vld [vmem:[#allocation2 + $0x218] sm:$0xff] }
  0x78   : > { %2295 = vrot.lane.b32.xlu1 %v2739_v14, %s2547_s25  ;;  %v625_v44 = vld [vmem:[#allocation2 + $0x1e0] sm:$0xff]  ;;  %v1092_v51 = vld [vmem:[#allocation5 + $0x208] sm:$0xff]  ;;  %v631_v56 = vld [vmem:[#allocation2 + $0x210] sm:$0xff] }
  0x79   : > { %2290 = vrot.lane.b32.xlu0 %v2732_v11, %s2546_s24  ;;  %1915 = vmatpush1.bf16.msra.mxu1 %v1914_v38  ;;  %v626_v38 = vld [vmem:[#allocation2 + $0x1e8] sm:$0xff]  ;;  %v1087_v48 = vld [vmem:[#allocation5 + $0x1e0] sm:$0xff]  ;;  %v636_v62 = vld [vmem:[#allocation2 + $0x238] sm:$0xff] }
  0x7a   : > { %1917 = vmatprep.subr.bf16.mxu1 %v1916_v42  ;;  %v1806_v42 = vpack.c.bf16 %v623_v33, %v621_v32  ;;  %v629_v55 = vld [vmem:[#allocation2 + $0x200] sm:$0xff]  ;;  %v635_v7 = vld [vmem:[#allocation2 + $0x230] sm:$0xff]  ;;  %v638_v17 = vld [vmem:[#allocation2 + $0x248] sm:$0xff] }
  0x7b   : > { %v1091_v59 = vld [vmem:[#allocation5 + $0x200] sm:$0xff]  ;;  %v1814_v63 = vpack.c.bf16 %v631_v56, %v629_v55  ;;  %v1097_v16 = vld [vmem:[#allocation5 + $0x230] sm:$0xff] }
  0x7c   : > { %2305 = vrot.lane.b32.xlu1 %v2732_v11, %s2547_s25  ;;  %v633_v6 = vld [vmem:[#allocation2 + $0x220] sm:$0xff]  ;;  %v639_v26 = vld [vmem:[#allocation2 + $0x250] sm:$0xff] }
  0x7d   : > { %2300 = vrot.lane.b32.xlu0 %v2747_v15, %s2547_s25  ;;  %1919 = vmatpush1.bf16.msra.mxu1 %v1918_v49  ;;  %v630_v49 = vld [vmem:[#allocation2 + $0x208] sm:$0xff]  ;;  %v1095_v8 = vld [vmem:[#allocation5 + $0x220] sm:$0xff] }
  0x7e   : > { %1921 = vmatprep.subr.bf16.mxu1 %v1920_v53  ;;  %v1810_v53 = vpack.c.bf16 %v627_v45, %v625_v44  ;;  %v1812_v57 = vpack.c.bf16 %v632_v50, %v630_v49  ;;  %v637_v25 = vld [vmem:[#allocation2 + $0x240] sm:$0xff]  ;;  %v650_v49 = vld [vmem:[#allocation2 + $0x2a8] sm:$0xff]  ;;  %v652_v50 = vld [vmem:[#allocation2 + $0x2b8] sm:$0xff] }
  0x7f   : > { %v1822_v32 = vpack.c.bf16 %v639_v26, %v637_v25  ;;  %v645_v45 = vld [vmem:[#allocation2 + $0x280] sm:$0xff]  ;;  %v1832_v55 = vpack.c.bf16 %v652_v50, %v650_v49  ;;  %v659_v26 = vld [vmem:[#allocation2 + $0x2f0] sm:$0xff]  ;;  %v670_v49 = vld [vmem:[#allocation2 + $0x348] sm:$0xff] }
  0x80   : > { %2315 = vrot.lane.b32.xlu1 %v2747_v15, %s2548_s27  ;;  %v1784_v15 = vpack.c.bf16 %v604_v21, %v602_v20  ;;  %v617_v20 = vld [vmem:[#allocation2 + $0x1a0] sm:$0xff]  ;;  %v619_v21 = vld [vmem:[#allocation2 + $0x1b0] sm:$0xff]  ;;  %v672_v50 = vld [vmem:[#allocation2 + $0x358] sm:$0xff] }
  0x81   : > { %2310 = vrot.lane.b32.xlu0 %v2739_v14, %s2548_s27  ;;  %v1786_v14 = vpack.c.bf16 %v603_v28, %v601_v27  ;;  %1923 = vmatpush1.bf16.msra.mxu1 %v1922_v61  ;;  %v622_v27 = vld [vmem:[#allocation2 + $0x1c8] sm:$0xff]  ;;  %v624_v28 = vld [vmem:[#allocation2 + $0x1d8] sm:$0xff]  ;;  %v1802_v30 = vpack.c.bf16 %v619_v21, %v617_v20  ;;  %v649_v56 = vld [vmem:[#allocation2 + $0x2a0] sm:$0xff] }
  0x82   : > { %1785 = vmatprep.subr.bf16.mxu0 %v1784_v15  ;;  %1925 = vmatprep.subr.bf16.mxu1 %v1924_v5  ;;  %v1086_v15 = vld [vmem:[#allocation5 + $0x1d8] sm:$0xff]  ;;  %v1804_v34 = vpack.c.bf16 %v624_v28, %v622_v27  ;;  %v634_v61 = vld [vmem:[#allocation2 + $0x228] sm:$0xff]  ;;  %v1099_v27 = vld [vmem:[#allocation5 + $0x240] sm:$0xff] }
  0x83   : > { %1787 = vmatpush1.bf16.msra.mxu0 %v1786_v14  ;;  %v1932_v35 = vpack.c.bf16 %v1086_v15, %v1084_v29  ;;  %v1085_v14 = vld [vmem:[#allocation5 + $0x1d0] sm:$0xff]  ;;  %v1816_v10 = vpack.c.bf16 %v636_v62, %v634_v61  ;;  %v1100_v20 = vld [vmem:[#allocation5 + $0x248] sm:$0xff]  ;;  %v1102_v21 = vld [vmem:[#allocation5 + $0x258] sm:$0xff] }
  0x84   : > { %2325 = vrot.lane.b32.xlu1 %v2794_v24, %s2542_s8  ;;  %1789 = vmatprep.subr.bf16.mxu0 %v1788_v41  ;;  %v1090_v41 = vld [vmem:[#allocation5 + $0x1f8] sm:$0xff]  ;;  %v1934_v43 = vpack.c.bf16 %v1085_v14, %v1083_v36  ;;  %v1948_v28 = vpack.c.bf16 %v1102_v21, %v1100_v20  ;;  %v1101_v29 = vld [vmem:[#allocation5 + $0x250] sm:$0xff]  ;;  %v642_v15 = vld [vmem:[#allocation2 + $0x268] sm:$0xff] }
  0x85   : > { %2320 = vrot.lane.b32.xlu0 %v2732_v11, %s2548_s27  ;;  %v1790_v11 = vpack.c.bf16 %v607_v40, %v605_v39  ;;  %1927 = vmatpush1.bf16.msra.mxu1 %v1926_v19  ;;  %v628_v39 = vld [vmem:[#allocation2 + $0x1f8] sm:$0xff]  ;;  %v1088_v40 = vld [vmem:[#allocation5 + $0x1e8] sm:$0xff]  ;;  %v1950_v33 = vpack.c.bf16 %v1101_v29, %v1099_v27  ;;  %v1103_v36 = vld [vmem:[#allocation5 + $0x260] sm:$0xff] }
  0x86   : > { %1929 = vmatprep.subr.bf16.mxu1 %v1928_v23  ;;  %v1808_v46 = vpack.c.bf16 %v628_v39, %v626_v38  ;;  %v1936_v47 = vpack.c.bf16 %v1090_v41, %v1088_v40  ;;  %v1105_v38 = vld [vmem:[#allocation5 + $0x270] sm:$0xff]  ;;  %v646_v39 = vld [vmem:[#allocation2 + $0x288] sm:$0xff]  ;;  %v648_v40 = vld [vmem:[#allocation2 + $0x298] sm:$0xff] }
  0x87   : > { %1791 = vmatpush1.bf16.msra.mxu0 %v1790_v11  ;;  %v1089_v11 = vld [vmem:[#allocation5 + $0x1f0] sm:$0xff]  ;;  %v1108_v41 = vld [vmem:[#allocation5 + $0x288] sm:$0xff]  ;;  %v1828_v44 = vpack.c.bf16 %v648_v40, %v646_v39  ;;  %v656_v62 = vld [vmem:[#allocation2 + $0x2d8] sm:$0xff] }
  0x88   : > { %2335 = vrot.lane.b32.xlu1 %v2794_v24, %s2543_s15  ;;  %1793 = vmatprep.subr.bf16.mxu0 %v1792_v52  ;;  %v1094_v52 = vld [vmem:[#allocation5 + $0x218] sm:$0xff]  ;;  %v1938_v54 = vpack.c.bf16 %v1089_v11, %v1087_v48  ;;  %v1109_v11 = vld [vmem:[#allocation5 + $0x290] sm:$0xff]  ;;  %v654_v61 = vld [vmem:[#allocation2 + $0x2c8] sm:$0xff] }
  0x89   : > { %2330 = vrot.lane.b32.xlu0 %v2807_v37, %s2542_s8  ;;  %1931 = vmatpush1.bf16.msra.mxu1 %v1930_v31  ;;  %v1940_v58 = vpack.c.bf16 %v1094_v52, %v1092_v51  ;;  %v1106_v31 = vld [vmem:[#allocation5 + $0x278] sm:$0xff]  ;;  %v1112_v51 = vld [vmem:[#allocation5 + $0x2a8] sm:$0xff]  ;;  %v657_v25 = vld [vmem:[#allocation2 + $0x2e0] sm:$0xff] }
  0x8a   : > { %1933 = vmatprep.subr.bf16.mxu1 %v1932_v35  ;;  %v641_v35 = vld [vmem:[#allocation2 + $0x260] sm:$0xff]  ;;  %v1114_v52 = vld [vmem:[#allocation5 + $0x2b8] sm:$0xff]  ;;  %v1120_v20 = vld [vmem:[#allocation5 + $0x2e8] sm:$0xff] }
  0x8b   : > { %1795 = vmatpush1.bf16.msra.mxu0 %v1794_v60  ;;  %v1093_v60 = vld [vmem:[#allocation5 + $0x210] sm:$0xff]  ;;  %v1122_v21 = vld [vmem:[#allocation5 + $0x2f8] sm:$0xff]  ;;  %v1119_v27 = vld [vmem:[#allocation5 + $0x2e0] sm:$0xff] }
  0x8c   : > { %2345 = vrot.lane.b32.xlu1 %v2794_v24, %s2544_s16  ;;  %1797 = vmatprep.subr.bf16.mxu0 %v1796_v4  ;;  %v1098_v4 = vld [vmem:[#allocation5 + $0x238] sm:$0xff]  ;;  %v1942_v5 = vpack.c.bf16 %v1093_v60, %v1091_v59  ;;  %v1960_v59 = vpack.c.bf16 %v1114_v52, %v1112_v51  ;;  %v1113_v60 = vld [vmem:[#allocation5 + $0x2b0] sm:$0xff]  ;;  %v666_v39 = vld [vmem:[#allocation2 + $0x328] sm:$0xff] }
  0x8d   : > { %2340 = vrot.lane.b32.xlu0 %v2807_v37, %s2543_s15  ;;  %1935 = vmatpush1.bf16.msra.mxu1 %v1934_v43  ;;  %v1121_v29 = vld [vmem:[#allocation5 + $0x2f0] sm:$0xff]  ;;  %v668_v40 = vld [vmem:[#allocation2 + $0x338] sm:$0xff]  ;;  %v1132_v51 = vld [vmem:[#allocation5 + $0x348] sm:$0xff] }
  0x8e   : > { %1937 = vmatprep.subr.bf16.mxu1 %v1936_v47  ;;  %v1107_v47 = vld [vmem:[#allocation5 + $0x280] sm:$0xff]  ;;  %v1134_v52 = vld [vmem:[#allocation5 + $0x358] sm:$0xff] }
  0x8f   : > { %1799 = vmatpush1.bf16.msra.mxu0 %v1798_v18  ;;  %v640_v18 = vld [vmem:[#allocation2 + $0x258] sm:$0xff] }
  0x90   : > { %2355 = vrot.lane.b32.xlu1 %v2794_v24, %s2545_s17  ;;  %1801 = vmatprep.subr.bf16.mxu0 %v1800_v22  ;;  %v1946_v22 = vpack.c.bf16 %v1097_v16, %v1095_v8  ;;  %v1820_v23 = vpack.c.bf16 %v640_v18, %v638_v17  ;;  %v655_v8 = vld [vmem:[#allocation2 + $0x2d0] sm:$0xff]  ;;  %v658_v18 = vld [vmem:[#allocation2 + $0x2e8] sm:$0xff] }
  0x91   : > { %2350 = vrot.lane.b32.xlu0 %v2807_v37, %s2544_s16  ;;  %1939 = vmatpush1.bf16.msra.mxu1 %v1938_v54  ;;  %v1958_v54 = vpack.c.bf16 %v1109_v11, %v1107_v47  ;;  %v1117_v17 = vld [vmem:[#allocation5 + $0x2d0] sm:$0xff]  ;;  %v1127_v47 = vld [vmem:[#allocation5 + $0x320] sm:$0xff]  ;;  %s3311_s16 = scalar_lea.hbm %s3371_s5, %s1747_s7 }
  0x92   : > { %1941 = vmatprep.subr.bf16.mxu1 %v1940_v58  ;;  %v1111_v58 = vld [vmem:[#allocation5 + $0x2a0] sm:$0xff]  ;;  %v1129_v11 = vld [vmem:[#allocation5 + $0x330] sm:$0xff] }
  0x93   : > { %1803 = vmatpush1.bf16.msra.mxu0 %v1802_v30  ;;  %v644_v30 = vld [vmem:[#allocation2 + $0x278] sm:$0xff] }
  0x94   : > { %2365 = vrot.lane.b32.xlu1 %v2794_v24, %s2546_s24  ;;  %1805 = vmatprep.subr.bf16.mxu0 %v1804_v34  ;;  %v1824_v34 = vpack.c.bf16 %v644_v30, %v642_v15  ;;  %v662_v15 = vld [vmem:[#allocation2 + $0x308] sm:$0xff]  ;;  %v664_v30 = vld [vmem:[#allocation2 + $0x318] sm:$0xff] }
  0x95   : > { %2360 = vrot.lane.b32.xlu0 %v2807_v37, %s2545_s17  ;;  %1232 = vmatmul.mubr.f32.vlgmr.msra.gmra.mrb[0].mxu1 %v2720_v2  ;;  %s2450_s17 = scalar_lea.vmem %s3313_s12, 4096 }
  0x96   : > { %1943 = vmatpush1.bf16.msra.mxu1 %v1942_v5  ;;  %1237 = vmatprep.mubr.f32.mxu1 %v2736_v13  ;;  %v1962_v5 = vpack.c.bf16 %v1113_v60, %v1111_v58  ;;  %v1131_v58 = vld [vmem:[#allocation5 + $0x340] sm:$0xff]  ;;  %v1133_v60 = vld [vmem:[#allocation5 + $0x350] sm:$0xff]  ;;  %p2451_p13 = scmp.ne.s32.totalorder %s3313_s12, %s2450_s17 }
  0x97   : > { %1807 = vmatpush1.bf16.msra.mxu0 %v1806_v42  ;;  %v1110_v42 = vld [vmem:[#allocation5 + $0x298] sm:$0xff] }
  0x98   : > { %2375 = vrot.lane.b32.xlu1 %v2794_v24, %s2547_s25  ;;  %1809 = vmatprep.subr.bf16.mxu0 %v1808_v46  ;;  %v647_v46 = vld [vmem:[#allocation2 + $0x290] sm:$0xff]  ;;  %v1956_v48 = vpack.c.bf16 %v1110_v42, %v1108_v41  ;;  %v1128_v41 = vld [vmem:[#allocation5 + $0x328] sm:$0xff]  ;;  %v1130_v42 = vld [vmem:[#allocation5 + $0x338] sm:$0xff]  ;;  %p2452_p10 = pnand %p2451_p13, %p3385_p8 }
  0x99   : > { %2370 = vrot.lane.b32.xlu0 %v2807_v37, %s2546_s24  ;;  %1238 = vmatmul.mubr.f32.gmra.mrb[2].mxu1 %v2716_v0  ;;  %s2549_s24 = smov [#allocation7]  }
  0x9a   : > { %p2453_p11 = pneg %p2452_p10 }
  0x9b   : > { %1811 = vmatpush1.bf16.msra.mxu0 %v1810_v53  ;;  %v1830_v53 = vpack.c.bf16 %v647_v46, %v645_v45  ;;  %v665_v45 = vld [vmem:[#allocation2 + $0x320] sm:$0xff]  ;;  %v667_v46 = vld [vmem:[#allocation2 + $0x330] sm:$0xff] }
  0x9c   : > { %2385 = vrot.lane.b32.xlu1 %v2794_v24, %s2548_s27  ;;  %v1096_v24 = vld [vmem:[#allocation5 + $0x228] sm:$0xff]  ;;  %1813 = vmatprep.subr.bf16.mxu0 %v1812_v57  ;;  %v651_v57 = vld [vmem:[#allocation2 + $0x2b0] sm:$0xff] }
  0x9d   : > { %2380 = vrot.lane.b32.xlu0 %v2807_v37, %s2547_s25  ;;  %v1944_v19 = vpack.c.bf16 %v1098_v4, %v1096_v24  ;;  %v1118_v24 = vld [vmem:[#allocation5 + $0x2d8] sm:$0xff]  ;;  %v1834_v4 = vpack.c.bf16 %v651_v57, %v649_v56  ;;  %v669_v56 = vld [vmem:[#allocation2 + $0x340] sm:$0xff]  ;;  %v671_v57 = vld [vmem:[#allocation2 + $0x350] sm:$0xff]  ;;  %s2454_s25 = sshll.u32 %s2549_s24, 4  ;;  %s2455_s25 = int_to_ptr.vmem [resolvable:$false] %s2454_s25 }
  0x9e   : > { %770 = vmatmul.mubr.f32.vlgmr.msra.gmra.mrb[0].mxu0 %v2720_v2  ;;  %v1104_v2 = vld [vmem:[#allocation5 + $0x268] sm:$0xff]  ;;  %s2456_s29 = scalar_lea.vmem %s2455_s25, 8192  ;;  %p2457_p2 = scmp.lt.s32.totalorder %s3313_s12, %s2455_s25 }
  0x9f   : > { %1815 = vmatpush1.bf16.msra.mxu0 %v1814_v63  ;;  %775 = vmatprep.mubr.f32.mxu0 %v2736_v13  ;;  %v643_v13 = vld [vmem:[#allocation2 + $0x270] sm:$0xff]  ;;  %v1952_v14 = vpack.c.bf16 %v1106_v31, %v1104_v2  ;;  %v1116_v63 = vld [vmem:[#allocation5 + $0x2c8] sm:$0xff]  ;;  %v1126_v31 = vld [vmem:[#allocation5 + $0x318] sm:$0xff]  ;;  %p2458_p3 = scmp.lt.s32.totalorder %s2456_s29, %s2450_s17 }
  0xa0   : > { %1817 = vmatprep.subr.bf16.mxu0 %v1816_v10  ;;  %1945 = vmatprep.subr.bf16.mxu1 %v1944_v19  ;;  %v1826_v43 = vpack.c.bf16 %v643_v13, %v641_v35  ;;  %v1115_v10 = vld [vmem:[#allocation5 + $0x2c0] sm:$0xff]  ;;  %v1964_v16 = vpack.c.bf16 %v1118_v24, %v1116_v63  ;;  %v660_v19 = vld [vmem:[#allocation2 + $0x2f8] sm:$0xff]  ;;  %v1124_v2 = vld [vmem:[#allocation5 + $0x308] sm:$0xff] }
  0xa1   : > { %2390 = vrot.lane.b32.xlu0 %v2807_v37, %s2548_s27  ;;  %v1818_v37 = vpack.c.bf16 %v635_v7, %v633_v6  ;;  %1947 = vmatpush1.bf16.msra.mxu1 %v1946_v22  ;;  %v1836_v6 = vpack.c.bf16 %v656_v62, %v654_v61  ;;  %v653_v7 = vld [vmem:[#allocation2 + $0x2c0] sm:$0xff]  ;;  %v1966_v22 = vpack.c.bf16 %v1117_v17, %v1115_v10  ;;  %v663_v13 = vld [vmem:[#allocation2 + $0x310] sm:$0xff]  ;;  %v674_v61 = vld [vmem:[#allocation2 + $0x368] sm:$0xff]  ;;  %p2459_p5 = por %p2458_p3, %p2457_p2 }
  0xa2   : > { %776 = vmatmul.mubr.f32.gmra.mrb[2].mxu0 %v2716_v0  ;;  %1949 = vmatprep.subr.bf16.mxu1 %v1948_v28  ;;  %v1954_v0 = vpack.c.bf16 %v1105_v38, %v1103_v36  ;;  %v1968_v28 = vpack.c.bf16 %v1122_v21, %v1120_v20  ;;  %v661_v35 = vld [vmem:[#allocation2 + $0x300] sm:$0xff]  ;;  %v1125_v38 = vld [vmem:[#allocation5 + $0x310] sm:$0xff]  ;;  %v676_v62 = vld [vmem:[#allocation2 + $0x378] sm:$0xff] }
  0xa3   : > { %1819 = vmatpush1.bf16.msra.mxu0 %v1818_v37  ;;  %v1838_v37 = vpack.c.bf16 %v655_v8, %v653_v7  ;;  %v1123_v36 = vld [vmem:[#allocation5 + $0x300] sm:$0xff]  ;;  %v1136_v63 = vld [vmem:[#allocation5 + $0x368] sm:$0xff]  ;;  %v1138_v24 = vld [vmem:[#allocation5 + $0x378] sm:$0xff]  ;;  %p2460_p6 = pnand %p2459_p5, %p2453_p11 }
  0xa4   : > { %1821 = vmatprep.subr.bf16.mxu0 %v1820_v23  ;;  %v1840_v23 = vpack.c.bf16 %v660_v19, %v658_v18  ;;  %v673_v7 = vld [vmem:[#allocation2 + $0x360] sm:$0xff]  ;;  %v675_v8 = vld [vmem:[#allocation2 + $0x370] sm:$0xff]  ;;  %v678_v18 = vld [vmem:[#allocation2 + $0x388] sm:$0xff] }
  0xa5   : > { %1951 = vmatpush1.bf16.msra.mxu1 %v1950_v33  ;;  %v1970_v33 = vpack.c.bf16 %v1121_v29, %v1119_v27  ;;  %v1135_v10 = vld [vmem:[#allocation5 + $0x360] sm:$0xff]  ;;  %v1137_v17 = vld [vmem:[#allocation5 + $0x370] sm:$0xff]  ;;  %v680_v19 = vld [vmem:[#allocation2 + $0x398] sm:$0xff] }
  0xa6   : > { %1953 = vmatprep.subr.bf16.mxu1 %v1952_v14  ;;  %v1972_v14 = vpack.c.bf16 %v1126_v31, %v1124_v2  ;;  %v1140_v20 = vld [vmem:[#allocation5 + $0x388] sm:$0xff]  ;;  %v1142_v21 = vld [vmem:[#allocation5 + $0x398] sm:$0xff]  ;;  %v1139_v27 = vld [vmem:[#allocation5 + $0x380] sm:$0xff] }
  0xa7   : > { %1823 = vmatpush1.bf16.msra.mxu0 %v1822_v32  ;;  %v1842_v32 = vpack.c.bf16 %v659_v26, %v657_v25  ;;  %v677_v25 = vld [vmem:[#allocation2 + $0x380] sm:$0xff]  ;;  %v679_v26 = vld [vmem:[#allocation2 + $0x390] sm:$0xff]  ;;  %v1988_v29 = vpack.c.bf16 %v1142_v21, %v1140_v20  ;;  %v684_v2 = vld [vmem:[#allocation2 + $0x3b8] sm:$0xff] }
  0xa8   : > { %1825 = vmatprep.subr.bf16.mxu0 %v1824_v34  ;;  %v1844_v34 = vpack.c.bf16 %v664_v30, %v662_v15  ;;  %v1141_v15 = vld [vmem:[#allocation5 + $0x390] sm:$0xff]  ;;  %v682_v30 = vld [vmem:[#allocation2 + $0x3a8] sm:$0xff]  ;;  %v689_v21 = vld [vmem:[#allocation2 + $0x3e0] sm:$0xff] }
  0xa9   : > { %1955 = vmatpush1.bf16.msra.mxu1 %v1954_v0  ;;  %v1974_v0 = vpack.c.bf16 %v1125_v38, %v1123_v36  ;;  %v1990_v36 = vpack.c.bf16 %v1141_v15, %v1139_v27  ;;  %v681_v38 = vld [vmem:[#allocation2 + $0x3a0] sm:$0xff] }
  0xaa   : > { %1957 = vmatprep.subr.bf16.mxu1 %v1956_v48  ;;  %v1976_v48 = vpack.c.bf16 %v1130_v42, %v1128_v41  ;;  %v1151_v27 = vld [vmem:[#allocation5 + $0x3e0] sm:$0xff] }
  0xab   : > { %1827 = vmatpush1.bf16.msra.mxu0 %v1826_v43  ;;  %v1846_v43 = vpack.c.bf16 %v663_v13, %v661_v35  ;;  %v1862_v13 = vpack.c.bf16 %v679_v26, %v677_v25 }
  0xac   : > { %1829 = vmatprep.subr.bf16.mxu0 %v1828_v44  ;;  %v1848_v44 = vpack.c.bf16 %v668_v40, %v666_v39  ;;  %v683_v39 = vld [vmem:[#allocation2 + $0x3b0] sm:$0xff]  ;;  %v1143_v40 = vld [vmem:[#allocation5 + $0x3a0] sm:$0xff] }
  0xad   : > { %1959 = vmatpush1.bf16.msra.mxu1 %v1958_v54  ;;  %v1978_v54 = vpack.c.bf16 %v1129_v11, %v1127_v47  ;;  %v1150_v11 = vld [vmem:[#allocation5 + $0x3d8] sm:$0xff] }
  0xae   : > { %1961 = vmatprep.subr.bf16.mxu1 %v1960_v59  ;;  %v1980_v59 = vpack.c.bf16 %v1134_v52, %v1132_v51  ;;  %v1866_v51 = vpack.c.bf16 %v683_v39, %v681_v38 }
  0xaf   : > { %1831 = vmatpush1.bf16.msra.mxu0 %v1830_v53  ;;  %v1850_v53 = vpack.c.bf16 %v667_v46, %v665_v45  ;;  %v686_v45 = vld [vmem:[#allocation2 + $0x3c8] sm:$0xff]  ;;  %v688_v46 = vld [vmem:[#allocation2 + $0x3d8] sm:$0xff] }
  0xb0   : > { %1833 = vmatprep.subr.bf16.mxu0 %v1832_v55  ;;  %v1852_v55 = vpack.c.bf16 %v672_v50, %v670_v49 }
  0xb1   : > { %1963 = vmatpush1.bf16.msra.mxu1 %v1962_v5  ;;  %v1982_v5 = vpack.c.bf16 %v1133_v60, %v1131_v58 }
  0xb2   : > { %1965 = vmatprep.subr.bf16.mxu1 %v1964_v16  ;;  %v1984_v16 = vpack.c.bf16 %v1138_v24, %v1136_v63  ;;  %v1147_v63 = vld [vmem:[#allocation5 + $0x3c0] sm:$0xff]  ;;  %v1149_v24 = vld [vmem:[#allocation5 + $0x3d0] sm:$0xff] }
  0xb3   : > { %1835 = vmatpush1.bf16.msra.mxu0 %v1834_v4  ;;  %v1854_v4 = vpack.c.bf16 %v671_v57, %v669_v56  ;;  %v685_v56 = vld [vmem:[#allocation2 + $0x3c0] sm:$0xff]  ;;  %v687_v57 = vld [vmem:[#allocation2 + $0x3d0] sm:$0xff]  ;;  %v1998_v20 = vpack.c.bf16 %v1149_v24, %v1147_v63 }
  0xb4   : > { %1837 = vmatprep.subr.bf16.mxu0 %v1836_v6  ;;  %v1856_v6 = vpack.c.bf16 %v676_v62, %v674_v61 }
  0xb5   : > { %1967 = vmatpush1.bf16.msra.mxu1 %v1966_v22  ;;  %v1986_v22 = vpack.c.bf16 %v1137_v17, %v1135_v10 }
  0xb6   : > { %1969 = vmatprep.subr.bf16.mxu1 %v1968_v28 }
  0xb7   : > { %1839 = vmatpush1.bf16.msra.mxu0 %v1838_v37  ;;  %v1858_v37 = vpack.c.bf16 %v675_v8, %v673_v7  ;;  %v1152_v7 = vld [vmem:[#allocation5 + $0x3e8] sm:$0xff]  ;;  %v1154_v8 = vld [vmem:[#allocation5 + $0x3f8] sm:$0xff] }
  0xb8   : > { %1841 = vmatprep.subr.bf16.mxu0 %v1840_v23  ;;  %v1860_v23 = vpack.c.bf16 %v680_v19, %v678_v18  ;;  %v2000_v26 = vpack.c.bf16 %v1154_v8, %v1152_v7 }
  0xb9   : > { %1971 = vmatpush1.bf16.msra.mxu1 %v1970_v33  ;;  %v1146_v33 = vld [vmem:[#allocation5 + $0x3b8] sm:$0xff] }
  0xba   : > { %1973 = vmatprep.subr.bf16.mxu1 %v1972_v14  ;;  %v1864_v14 = vpack.c.bf16 %v684_v2, %v682_v30 }
  0xbb   : > { %1843 = vmatpush1.bf16.msra.mxu0 %v1842_v32  ;;  %v1144_v32 = vld [vmem:[#allocation5 + $0x3a8] sm:$0xff] }
  0xbc   : > { %1845 = vmatprep.subr.bf16.mxu0 %v1844_v34 }
  0xbd   : > { %1975 = vmatpush1.bf16.msra.mxu1 %v1974_v0  ;;  %v1992_v0 = vpack.c.bf16 %v1146_v33, %v1144_v32 }
  0xbe   : > { %1977 = vmatprep.subr.bf16.mxu1 %v1976_v48  ;;  %v1148_v48 = vld [vmem:[#allocation5 + $0x3c8] sm:$0xff] }
  0xbf   : > { %1847 = vmatpush1.bf16.msra.mxu0 %v1846_v43  ;;  %v1996_v62 = vpack.c.bf16 %v1150_v11, %v1148_v48 }
  0xc0   : > { %1849 = vmatprep.subr.bf16.mxu0 %v1848_v44  ;;  %v1145_v44 = vld [vmem:[#allocation5 + $0x3b0] sm:$0xff] }
  0xc1   : > { %1979 = vmatpush1.bf16.msra.mxu1 %v1978_v54  ;;  %v1994_v54 = vpack.c.bf16 %v1145_v44, %v1143_v40 }
  0xc2   : > { %1981 = vmatprep.subr.bf16.mxu1 %v1980_v59 }
  0xc3   : > { %1851 = vmatpush1.bf16.msra.mxu0 %v1850_v53 }
  0xc4   : > { %1853 = vmatprep.subr.bf16.mxu0 %v1852_v55  ;;  %v1868_v55 = vpack.c.bf16 %v688_v46, %v686_v45 }
  0xc5   : > { %1983 = vmatpush1.bf16.msra.mxu1 %v1982_v5 }
  0xc6   : > { %1985 = vmatprep.subr.bf16.mxu1 %v1984_v16  ;;  %v1870_v16 = vpack.c.bf16 %v687_v57, %v685_v56 }
  0xc7   : > { %1855 = vmatpush1.bf16.msra.mxu0 %v1854_v4  ;;  %v690_v4 = vld [vmem:[#allocation2 + $0x3e8] sm:$0xff] }
  0xc8   : > { %1857 = vmatprep.subr.bf16.mxu0 %v1856_v6  ;;  %v692_v6 = vld [vmem:[#allocation2 + $0x3f8] sm:$0xff] }
  0xc9   : > { %1987 = vmatpush1.bf16.msra.mxu1 %v1986_v22  ;;  %v1872_v25 = vpack.c.bf16 %v692_v6, %v690_v4 }
  0xca   : > { %1989 = vmatprep.subr.bf16.mxu1 %v1988_v29  ;;  %v1153_v29 = vld [vmem:[#allocation5 + $0x3f0] sm:$0xff] }
  0xcb   : > { %1859 = vmatpush1.bf16.msra.mxu0 %v1858_v37  ;;  %v691_v37 = vld [vmem:[#allocation2 + $0x3f0] sm:$0xff] }
  0xcc   : > { %1861 = vmatprep.subr.bf16.mxu0 %v1860_v23  ;;  %v1874_v2 = vpack.c.bf16 %v691_v37, %v689_v21 }
  0xcd   : > { %1991 = vmatpush1.bf16.msra.mxu1 %v1990_v36 }
  0xce   : > { %v2841_v28 = vpop.permute.xlu1 %2230  ;;  %1993 = vmatprep.subr.bf16.mxu1 %v1992_v0 }
  0xcf   : > { %v2843_v31 = vpop.permute.xlu0 %2220  ;;  %v2232_v41 = vunpack.i.l.bf16 %v2841_v28  ;;  %1863 = vmatpush1.bf16.msra.mxu0 %v1862_v13  ;;  %v2233_v58 = vunpack.i.h.bf16 %v2841_v28  ;;  %v2002_v13 = vpack.c.bf16 %v1153_v29, %v1151_v27 }
  0xd0   : > { %v2223_v34 = vunpack.i.h.bf16 %v2843_v31  ;;  %v2222_v35 = vunpack.i.l.bf16 %v2843_v31  ;;  %1865 = vmatprep.subr.bf16.mxu0 %v1864_v14 }
  0xd1   : > { %1995 = vmatpush1.bf16.msra.mxu1 %v1994_v54 }
  0xd2   : > { %v2848_v42 = vpop.permute.xlu1 %2235  ;;  %v328_v43 = vsel %vm326_vm4, %v2222_v35, %v2223_v34  ;;  %1997 = vmatprep.subr.bf16.mxu1 %v1996_v62 }
  0xd3   : > { %v2226_v47 = vpop.permute.xlu0 %2225  ;;  %781 = vmatprep.mubr.f32.mxu0 %v328_v43  ;;  %1243 = vmatprep.mubr.f32.mxu1 %v328_v43  ;;  %v2238_v52 = vunpack.i.h.bf16 %v2848_v42  ;;  %v2237_v53 = vunpack.i.l.bf16 %v2848_v42 }
  0xd4   : > { %v2228_v49 = vunpack.i.h.bf16 %v2226_v47  ;;  %v2227_v50 = vunpack.i.l.bf16 %v2226_v47  ;;  %1867 = vmatpush1.bf16.msra.mxu0 %v1866_v51 }
  0xd5   : > { %v365_v19 = vsel %vm363_vm5, %v2237_v53, %v2238_v52  ;;  %1869 = vmatprep.subr.bf16.mxu0 %v1868_v55  ;;  %1999 = vmatpush1.bf16.msra.mxu1 %v1998_v20 }
  0xd6   : > { %v2856_v59 = vpop.permute.xlu1 %2245  ;;  %v327_v60 = vsel %vm326_vm4, %v2227_v50, %v2222_v35  ;;  %v332_v61 = vsel %vm326_vm4, %v2228_v49, %v2232_v41  ;;  %v331_v23 = vsel %vm326_vm4, %v2233_v58, %v2228_v49  ;;  %2001 = vmatprep.subr.bf16.mxu1 %v2000_v26 }
  0xd7   : > { %v2241_v5 = vpop.permute.xlu0 %2240  ;;  %782 = vmatmul.mubr.f32.gmra.mrb[4].mxu0 %v327_v60  ;;  %1244 = vmatmul.mubr.f32.gmra.mrb[4].mxu1 %v327_v60  ;;  %v2247_v17 = vunpack.i.l.bf16 %v2856_v59  ;;  %v2248_v36 = vunpack.i.h.bf16 %v2856_v59 }
  0xd8   : > { %v2242_v10 = vunpack.i.l.bf16 %v2241_v5  ;;  %787 = vmatprep.mubr.f32.mxu0 %v332_v61  ;;  %1249 = vmatprep.mubr.f32.mxu1 %v332_v61  ;;  %v2243_v18 = vunpack.i.h.bf16 %v2241_v5 }
  0xd9   : > { %1871 = vmatpush1.bf16.msra.mxu0 %v1870_v16  ;;  %2003 = vmatpush1.bf16.msra.mxu1 %v2002_v13 }
  0xda   : > { %v2866_v22 = vpop.permute.xlu1 %2255  ;;  %v364_v30 = vsel %vm363_vm5, %v2242_v10, %v2237_v53  ;;  %v369_v35 = vsel %vm363_vm5, %v2243_v18, %v2247_v17  ;;  %1873 = vmatprep.subr.bf16.mxu0 %v1872_v25  ;;  %v368_v45 = vsel %vm363_vm5, %v2248_v36, %v2243_v18 }
  0xdb   : > { %v2869_v15 = vpop.permute.xlu0 %2250  ;;  %788 = vmatmul.mubr.f32.gmra.mrb[6].mxu0 %v331_v23  ;;  %1250 = vmatmul.mubr.f32.gmra.mrb[6].mxu1 %v331_v23  ;;  %v2257_v39 = vunpack.i.l.bf16 %v2866_v22  ;;  %v2258_v40 = vunpack.i.h.bf16 %v2866_v22 }
  0xdc   : > { %793 = vmatprep.mubr.f32.mxu0 %v365_v19  ;;  %1255 = vmatprep.mubr.f32.mxu1 %v365_v19  ;;  %v2253_v32 = vunpack.i.h.bf16 %v2869_v15  ;;  %v2252_v33 = vunpack.i.l.bf16 %v2869_v15 }
  0xdd   : > { %1875 = vmatpush1.bf16.msra.mxu0 %v1874_v2 }
  0xde   : > { %v2878_v14 = vpop.permute.xlu1 %2265  ;;  %v402_v0 = vsel %vm400_vm6, %v2252_v33, %v2253_v32  ;;  %v401_v47 = vsel %vm400_vm6, %v2257_v39, %v2252_v33 }
  0xdf   : > { %v2880_v38 = vpop.permute.xlu0 %2260  ;;  %794 = vmatmul.mubr.f32.gmra.mrb[8].mxu0 %v364_v30  ;;  %1256 = vmatmul.mubr.f32.gmra.mrb[8].mxu1 %v364_v30  ;;  %v2268_v48 = vunpack.i.h.bf16 %v2878_v14  ;;  %v2267_v11 = vunpack.i.l.bf16 %v2878_v14 }
  0xe0   : > { %799 = vmatprep.mubr.f32.mxu0 %v369_v35  ;;  %1261 = vmatprep.mubr.f32.mxu1 %v369_v35  ;;  %v2262_v43 = vunpack.i.l.bf16 %v2880_v38  ;;  %v2263_v50 = vunpack.i.h.bf16 %v2880_v38 }
  0xe1   : > { %v439_v57 = vsel %vm437_vm7, %v2267_v11, %v2268_v48 }
  0xe2   : > { %v2888_v44 = vpop.permute.xlu1 %2275  ;;  %v406_v49 = vsel %vm400_vm6, %v2258_v40, %v2262_v43  ;;  %v405_v60 = vsel %vm400_vm6, %v2263_v50, %v2258_v40 }
  0xe3   : > { %v2271_v46 = vpop.permute.xlu0 %2270  ;;  %800 = vmatmul.mubr.f32.gmra.mrb[10].mxu0 %v368_v45  ;;  %1262 = vmatmul.mubr.f32.gmra.mrb[10].mxu1 %v368_v45  ;;  %v2277_v55 = vunpack.i.l.bf16 %v2888_v44  ;;  %v2278_v5 = vunpack.i.h.bf16 %v2888_v44 }
  0xe4   : > { %805 = vmatprep.mubr.f32.mxu0 %v402_v0  ;;  %1267 = vmatprep.mubr.f32.mxu1 %v402_v0  ;;  %v2272_v54 = vunpack.i.l.bf16 %v2271_v46  ;;  %v2273_v56 = vunpack.i.h.bf16 %v2271_v46 }
  0xe6   : > { %v2286_v51 = vpop.permute.xlu1 %2285  ;;  %v438_v62 = vsel %vm437_vm7, %v2272_v54, %v2267_v11  ;;  %v443_v4 = vsel %vm437_vm7, %v2273_v56, %v2277_v55  ;;  %v442_v20 = vsel %vm437_vm7, %v2278_v5, %v2273_v56 }
  0xe7   : > { %v2898_v53 = vpop.permute.xlu0 %2280  ;;  %806 = vmatmul.mubr.f32.gmra.mrb[12].mxu0 %v401_v47  ;;  %1268 = vmatmul.mubr.f32.gmra.mrb[12].mxu1 %v401_v47  ;;  %v2287_v8 = vunpack.i.l.bf16 %v2286_v51  ;;  %v2288_v10 = vunpack.i.h.bf16 %v2286_v51 }
  0xe8   : > { %811 = vmatprep.mubr.f32.mxu0 %v406_v49  ;;  %1273 = vmatprep.mubr.f32.mxu1 %v406_v49  ;;  %v2283_v63 = vunpack.i.h.bf16 %v2898_v53  ;;  %v2282_v24 = vunpack.i.l.bf16 %v2898_v53 }
  0xea   : > { %v2904_v58 = vpop.permute.xlu1 %2295  ;;  %v476_v18 = vsel %vm474_vm8, %v2282_v24, %v2283_v63  ;;  %v475_v37 = vsel %vm474_vm8, %v2287_v8, %v2282_v24 }
  0xeb   : > { %v2907_v61 = vpop.permute.xlu0 %2290  ;;  %812 = vmatmul.mubr.f32.gmra.mrb[14].mxu0 %v405_v60  ;;  %1274 = vmatmul.mubr.f32.gmra.mrb[14].mxu1 %v405_v60  ;;  %v2298_v22 = vunpack.i.h.bf16 %v2904_v58  ;;  %v2297_v23 = vunpack.i.l.bf16 %v2904_v58 }
  0xec   : > { %817 = vmatprep.mubr.f32.mxu0 %v439_v57  ;;  %1279 = vmatprep.mubr.f32.mxu1 %v439_v57  ;;  %v2292_v16 = vunpack.i.l.bf16 %v2907_v61  ;;  %v2293_v26 = vunpack.i.h.bf16 %v2907_v61 }
  0xed   : > { %v513_v13 = vsel %vm511_vm9, %v2297_v23, %v2298_v22 }
  0xee   : > { %v2916_v6 = vpop.permute.xlu1 %2305  ;;  %v480_v25 = vsel %vm474_vm8, %v2288_v10, %v2292_v16  ;;  %v479_v40 = vsel %vm474_vm8, %v2293_v26, %v2288_v10 }
  0xef   : > { %v2918_v7 = vpop.permute.xlu0 %2300  ;;  %818 = vmatmul.mubr.f32.gmra.mrb[16].mxu0 %v438_v62  ;;  %1280 = vmatmul.mubr.f32.gmra.mrb[16].mxu1 %v438_v62  ;;  %v2307_v33 = vunpack.i.l.bf16 %v2916_v6  ;;  %v2308_v50 = vunpack.i.h.bf16 %v2916_v6 }
  0xf0   : > { %823 = vmatprep.mubr.f32.mxu0 %v443_v4  ;;  %1285 = vmatprep.mubr.f32.mxu1 %v443_v4  ;;  %v2302_v2 = vunpack.i.l.bf16 %v2918_v7  ;;  %v2303_v35 = vunpack.i.h.bf16 %v2918_v7 }
  0xf2   : > { %v2924_v19 = vpop.permute.xlu1 %2315  ;;  %v512_v47 = vsel %vm511_vm9, %v2302_v2, %v2297_v23  ;;  %v517_v11 = vsel %vm511_vm9, %v2303_v35, %v2307_v33  ;;  %v516_v4 = vsel %vm511_vm9, %v2308_v50, %v2303_v35 }
  0xf3   : > { %v2927_v21 = vpop.permute.xlu0 %2310  ;;  %824 = vmatmul.mubr.f32.gmra.mrb[18].mxu0 %v442_v20  ;;  %1286 = vmatmul.mubr.f32.gmra.mrb[18].mxu1 %v442_v20  ;;  %v2317_v42 = vunpack.i.l.bf16 %v2924_v19  ;;  %v2318_v60 = vunpack.i.h.bf16 %v2924_v19 }
  0xf4   : > { %829 = vmatprep.mubr.f32.mxu0 %v476_v18  ;;  %1291 = vmatprep.mubr.f32.mxu1 %v476_v18  ;;  %v2313_v31 = vunpack.i.h.bf16 %v2927_v21 }
  0xf6   : > { %v2936_v27 = vpop.permute.xlu1 %2325 }
  0xf7   : > { %v2327_v29 = vunpack.i.l.bf16 %v2936_v27  ;;  %v2939_v30 = vpop.permute.xlu0 %2320  ;;  %830 = vmatmul.mubr.f32.gmra.mrb[20].mxu0 %v475_v37  ;;  %1292 = vmatmul.mubr.f32.gmra.mrb[20].mxu1 %v475_v37 }
  0xf8   : > { %835 = vmatprep.mubr.f32.mxu0 %v480_v25  ;;  %1297 = vmatprep.mubr.f32.mxu1 %v480_v25  ;;  %v2322_v62 = vunpack.i.l.bf16 %v2939_v30 }
  0xf9   : > { %v2952_v36 = vsel %vm326_vm4, %v2223_v34, %v2327_v29  ;;  %v2312_v34 = vunpack.i.l.bf16 %v2927_v21 }
  0xfa   : > { %v2954_v39 = vpop.permute.xlu1 %2335  ;;  %v554_v10 = vsel %vm548_vm10, %v2318_v60, %v2322_v62 }
  0xfb   : > { %v2337_v0 = vunpack.i.l.bf16 %v2954_v39  ;;  %v2958_v45 = vpop.permute.xlu0 %2330  ;;  %836 = vmatmul.mubr.f32.gmra.mrb[22].mxu0 %v479_v40  ;;  %1298 = vmatmul.mubr.f32.gmra.mrb[22].mxu1 %v479_v40  ;;  %v550_v28 = vsel %vm548_vm10, %v2312_v34, %v2313_v31  ;;  %v2338_v21 = vunpack.i.h.bf16 %v2954_v39 }
  0xfc   : > { %v2332_v46 = vunpack.i.l.bf16 %v2958_v45  ;;  %841 = vmatprep.mubr.f32.mxu0 %v513_v13  ;;  %1303 = vmatprep.mubr.f32.mxu1 %v513_v13 }
  0xfd   : > { %v2972_v49 = vsel %vm363_vm5, %v2238_v52, %v2337_v0 }
  0xfe   : > { %v2975_v51 = vpop.permute.xlu1 %2345  ;;  %v2982_v54 = vsel %vm326_vm4, %v2232_v41, %v2332_v46 }
  0xff   : > { %v2347_v56 = vunpack.i.l.bf16 %v2975_v51  ;;  %v2985_v57 = vpop.permute.xlu0 %2340  ;;  %842 = vmatmul.mubr.f32.gmra.mrb[24].mxu0 %v512_v47  ;;  %1304 = vmatmul.mubr.f32.gmra.mrb[24].mxu1 %v512_v47  ;;  %v2348_v35 = vunpack.i.h.bf16 %v2975_v51 }
 0x100   : > { %v2342_v52 = vunpack.i.l.bf16 %v2985_v57  ;;  %847 = vmatprep.mubr.f32.mxu0 %v517_v11  ;;  %1309 = vmatprep.mubr.f32.mxu1 %v517_v11 }
 0x101   : > { %v2999_v41 = vsel %vm400_vm6, %v2253_v32, %v2347_v56  ;;  %v549_v32 = vsel %vm548_vm10, %v2317_v42, %v2312_v34  ;;  %v404_v39 = vsel %vm400_vm6, %v2347_v56, %v2348_v35 }
 0x102   : > { %v3001_v24 = vpop.permute.xlu1 %2355  ;;  %v3009_v5 = vsel %vm363_vm5, %v2247_v17, %v2342_v52  ;;  %v2323_v17 = vunpack.i.h.bf16 %v2939_v30 }
 0x103   : > { %v2357_v7 = vunpack.i.l.bf16 %v3001_v24  ;;  %v3012_v8 = vpop.permute.xlu0 %2350  ;;  %848 = vmatmul.mubr.f32.gmra.mrb[26].mxu0 %v516_v4  ;;  %1310 = vmatmul.mubr.f32.gmra.mrb[26].mxu1 %v516_v4  ;;  %v2358_v40 = vunpack.i.h.bf16 %v3001_v24  ;;  %v693_v24 = vld [vmem:[%s3369_s3] sm:$0x3] }
 0x104   : > { %v2352_v15 = vunpack.i.l.bf16 %v3012_v8  ;;  %853 = vmatprep.mubr.f32.mxu0 %v550_v28  ;;  %1315 = vmatprep.mubr.f32.mxu1 %v550_v28  ;;  %v1155_v4 = vld [vmem:[%s3370_s4] sm:$0x3] }
 0x105   : > { %v3022_v59 = vsel %vm437_vm7, %v2268_v48, %v2357_v7 }
 0x106   : > { %v3025_v18 = vpop.permute.xlu1 %2365  ;;  %v3032_v19 = vsel %vm400_vm6, %v2262_v43, %v2352_v15  ;;  %v553_v43 = vsel %vm548_vm10, %v2323_v17, %v2318_v60 }
 0x107   : > { %v2367_v20 = vunpack.i.l.bf16 %v3025_v18  ;;  %v3035_v37 = vpop.permute.xlu0 %2360  ;;  %854 = vmatmul.mubr.f32.gmra.mrb[28].mxu0 %v549_v32  ;;  %1316 = vmatmul.mubr.f32.gmra.mrb[28].mxu1 %v549_v32  ;;  %v2368_v47 = vunpack.i.h.bf16 %v3025_v18 }
 0x108   : > { %v2362_v14 = vunpack.i.l.bf16 %v3035_v37  ;;  %859 = vmatprep.mubr.f32.mxu0 %v554_v10  ;;  %1321 = vmatprep.mubr.f32.mxu1 %v554_v10 }
 0x109   : > { %v3043_v48 = vsel %vm474_vm8, %v2283_v63, %v2367_v20  ;;  %v2328_v63 = vunpack.i.h.bf16 %v2936_v27  ;;  %v478_v11 = vsel %vm474_vm8, %v2367_v20, %v2368_v47 }
 0x10a   : > { %v3045_v38 = vpop.permute.xlu1 %2375  ;;  %v3053_v23 = vsel %vm437_vm7, %v2277_v55, %v2362_v14 }
 0x10b   : > { %v2377_v25 = vunpack.i.l.bf16 %v3045_v38  ;;  %v3056_v26 = vpop.permute.xlu0 %2370  ;;  %860 = vmatmul.mubr.f32.gmra.mrb[30].mxu0 %v553_v43  ;;  %1322 = vmatmul.mubr.f32.gmra.mrb[30].mxu1 %v553_v43  ;;  %v330_v61 = vsel %vm326_vm4, %v2327_v29, %v2328_v63 }
 0x10c   : > { %v2372_v53 = vunpack.i.l.bf16 %v3056_v26  ;;  %930 = vmatprep.mubr.f32.mxu0 %v2786_v3  ;;  %1392 = vmatprep.mubr.f32.mxu1 %v2786_v3  ;;  %v2373_v34 = vunpack.i.h.bf16 %v3056_v26 }
 0x10d   : > { %v3067_v44 = vsel %vm511_vm9, %v2298_v22, %v2377_v25  ;;  %v2333_v22 = vunpack.i.h.bf16 %v2958_v45  ;;  %v2363_v45 = vunpack.i.h.bf16 %v3035_v37 }
 0x10e   : > { %v3069_v55 = vpop.permute.xlu1 %2385  ;;  %v3076_v30 = vsel %vm474_vm8, %v2292_v16, %v2372_v53  ;;  %v482_v50 = vsel %vm474_vm8, %v2372_v53, %v2373_v34 }
 0x10f   : > { %v2387_v3 = vunpack.i.l.bf16 %v3069_v55  ;;  %v3079_v2 = vpop.permute.xlu0 %2380  ;;  %931 = vmatmul.mubr.f32.vlgmr.msra.gmra.mrb[0].mxu0 %v2734_v12  ;;  %1393 = vmatmul.mubr.f32.vlgmr.msra.gmra.mrb[0].mxu1 %v2734_v12  ;;  %v334_v29 = vsel %vm326_vm4, %v2332_v46, %v2333_v22  ;;  %v441_v46 = vsel %vm437_vm7, %v2357_v7, %v2358_v40  ;;  %v2388_v56 = vunpack.i.h.bf16 %v3069_v55 }
 0x110   : > { %v2382_v58 = vunpack.i.l.bf16 %v3079_v2  ;;  %936 = vmatprep.mubr.f32.mxu0 %v2799_v1  ;;  %1398 = vmatprep.mubr.f32.mxu1 %v2799_v1  ;;  %v2383_v51 = vunpack.i.h.bf16 %v3079_v2 }
 0x111   : > { %v3095_v16 = vsel %vm548_vm10, %v2313_v31, %v2387_v3  ;;  %v445_v31 = vsel %vm437_vm7, %v2362_v14, %v2363_v45 }
 0x112   : > { %v3102_v12 = vsel %vm511_vm9, %v2307_v33, %v2382_v58  ;;  %v367_v33 = vsel %vm363_vm5, %v2337_v0, %v2338_v21 }
 0x113   : > { %v3104_v1 = vpop.permute.xlu0 %2390  ;;  %937 = vmatmul.mubr.f32.gmra.mrb[2].mxu0 %v2728_v9  ;;  %1399 = vmatmul.mubr.f32.gmra.mrb[2].mxu1 %v2728_v9  ;;  %v2343_v9 = vunpack.i.h.bf16 %v2985_v57  ;;  %v519_v57 = vsel %vm511_vm9, %v2382_v58, %v2383_v51 }
 0x114   : > { %v2392_v27 = vunpack.i.l.bf16 %v3104_v1  ;;  %942 = vmatprep.mubr.f32.mxu0 %v330_v61  ;;  %1404 = vmatprep.mubr.f32.mxu1 %v330_v61  ;;  %v2393_v42 = vunpack.i.h.bf16 %v3104_v1 }
 0x115   : > { %v371_v13 = vsel %vm363_vm5, %v2342_v52, %v2343_v9  ;;  %v552_v52 = vsel %vm548_vm10, %v2387_v3, %v2388_v56 }
 0x116   : > { %v3116_v6 = vsel %vm548_vm10, %v2322_v62, %v2392_v27  ;;  %v556_v60 = vsel %vm548_vm10, %v2392_v27, %v2393_v42  ;;  %v695_v62 = vlaneseq }
 0x117   : > { %943 = vmatmul.mubr.f32.gmra.mrb[4].mxu0 %v2952_v36  ;;  %1405 = vmatmul.mubr.f32.gmra.mrb[4].mxu1 %v2952_v36  ;;  %v2353_v36 = vunpack.i.h.bf16 %v3012_v8 }
 0x118   : > { %948 = vmatprep.mubr.f32.mxu0 %v334_v29  ;;  %1410 = vmatprep.mubr.f32.mxu1 %v334_v29  ;;  %v696_v28 = vshrl.u32 %v695_v62, 7 }
 0x119   : > { %v408_v0 = vsel %vm400_vm6, %v2352_v15, %v2353_v36 }
 0x11b   : > { %949 = vmatmul.mubr.f32.gmra.mrb[6].mxu0 %v2982_v54  ;;  %1411 = vmatmul.mubr.f32.gmra.mrb[6].mxu1 %v2982_v54 }
 0x11c   : > { %954 = vmatprep.mubr.f32.mxu0 %v367_v33  ;;  %1416 = vmatprep.mubr.f32.mxu1 %v367_v33 }
 0x11f   : > { %955 = vmatmul.mubr.f32.gmra.mrb[8].mxu0 %v2972_v49  ;;  %1417 = vmatmul.mubr.f32.gmra.mrb[8].mxu1 %v2972_v49  ;;  %v2378_v49 = vunpack.i.h.bf16 %v3045_v38 }
 0x120   : > { %960 = vmatprep.mubr.f32.mxu0 %v371_v13  ;;  %1422 = vmatprep.mubr.f32.mxu1 %v371_v13 }
 0x121   : > { %v515_v54 = vsel %vm511_vm9, %v2377_v25, %v2378_v49 }
 0x123   : > { %961 = vmatmul.mubr.f32.gmra.mrb[10].mxu0 %v3009_v5  ;;  %1423 = vmatmul.mubr.f32.gmra.mrb[10].mxu1 %v3009_v5  ;;  %v701_v5 = vsub.s32 1, %v696_v28 }
 0x124   : > { %966 = vmatprep.mubr.f32.mxu0 %v404_v39  ;;  %1428 = vmatprep.mubr.f32.mxu1 %v404_v39 }
 0x125   : > { %v3204_v15 = vrot.slane %v693_v24, %v701_v5  ;;  %v3206_v32 = vrot.slane %v1155_v4, %v701_v5 }
 0x127   : > { %967 = vmatmul.mubr.f32.gmra.mrb[12].mxu0 %v2999_v41  ;;  %1429 = vmatmul.mubr.f32.gmra.mrb[12].mxu1 %v2999_v41  ;;  %v697_v41 = vsub.s32 0, %v696_v28 }
 0x128   : > { %972 = vmatprep.mubr.f32.mxu0 %v408_v0  ;;  %1434 = vmatprep.mubr.f32.mxu1 %v408_v0 }
 0x129   : > { %v3199_v7 = vrot.slane %v693_v24, %v697_v41  ;;  %v3201_v8 = vrot.slane %v1155_v4, %v697_v41 }
 0x12b   : > { %973 = vmatmul.mubr.f32.gmra.mrb[14].mxu0 %v3032_v19  ;;  %1435 = vmatmul.mubr.f32.gmra.mrb[14].mxu1 %v3032_v19 }
 0x12c   : > { %978 = vmatprep.mubr.f32.mxu0 %v441_v46  ;;  %1440 = vmatprep.mubr.f32.mxu1 %v441_v46 }
 0x12f   : > { %979 = vmatmul.mubr.f32.gmra.mrb[16].mxu0 %v3022_v59  ;;  %1441 = vmatmul.mubr.f32.gmra.mrb[16].mxu1 %v3022_v59 }
 0x130   : > { %984 = vmatprep.mubr.f32.mxu0 %v445_v31  ;;  %1446 = vmatprep.mubr.f32.mxu1 %v445_v31 }
 0x133   : > { %985 = vmatmul.mubr.f32.gmra.mrb[18].mxu0 %v3053_v23  ;;  %1447 = vmatmul.mubr.f32.gmra.mrb[18].mxu1 %v3053_v23 }
 0x134   : > { %990 = vmatprep.mubr.f32.mxu0 %v478_v11  ;;  %1452 = vmatprep.mubr.f32.mxu1 %v478_v11 }
 0x137   : > { %991 = vmatmul.mubr.f32.gmra.mrb[20].mxu0 %v3043_v48  ;;  %1453 = vmatmul.mubr.f32.gmra.mrb[20].mxu1 %v3043_v48 }
 0x138   : > { %996 = vmatprep.mubr.f32.mxu0 %v482_v50  ;;  %1458 = vmatprep.mubr.f32.mxu1 %v482_v50 }
 0x13b   : > { %997 = vmatmul.mubr.f32.gmra.mrb[22].mxu0 %v3076_v30  ;;  %1459 = vmatmul.mubr.f32.gmra.mrb[22].mxu1 %v3076_v30 }
 0x13c   : > { %1002 = vmatprep.mubr.f32.mxu0 %v515_v54  ;;  %1464 = vmatprep.mubr.f32.mxu1 %v515_v54 }
 0x13f   : > { %1003 = vmatmul.mubr.f32.gmra.mrb[24].mxu0 %v3067_v44  ;;  %1465 = vmatmul.mubr.f32.gmra.mrb[24].mxu1 %v3067_v44 }
 0x140   : > { %1008 = vmatprep.mubr.f32.mxu0 %v519_v57  ;;  %1470 = vmatprep.mubr.f32.mxu1 %v519_v57 }
 0x143   : > { %1009 = vmatmul.mubr.f32.gmra.mrb[26].mxu0 %v3102_v12  ;;  %1471 = vmatmul.mubr.f32.gmra.mrb[26].mxu1 %v3102_v12 }
 0x144   : > { %1014 = vmatprep.mubr.f32.mxu0 %v552_v52  ;;  %1476 = vmatprep.mubr.f32.mxu1 %v552_v52 }
 0x147   : > { %1015 = vmatmul.mubr.f32.gmra.mrb[28].mxu0 %v3095_v16  ;;  %1477 = vmatmul.mubr.f32.gmra.mrb[28].mxu1 %v3095_v16 }
 0x148   : > { %1020 = vmatprep.mubr.f32.mxu0 %v556_v60  ;;  %1482 = vmatprep.mubr.f32.mxu1 %v556_v60 }
 0x14b   : > { %1021 = vmatmul.mubr.f32.gmra.mrb[30].mxu0 %v3116_v6  ;;  %1483 = vmatmul.mubr.f32.gmra.mrb[30].mxu1 %v3116_v6 }
 0x1e2   : > { %v932_v10 = vpop.f32.mrb[0].mxu0  ;;  %v1394_v59 = vpop.f32.mrb[0].mxu1 }
 0x1e3   : > { %v2004_v17 = vadd.f32 %v932_v10, %v3199_v7  ;;  %v2036_v18 = vadd.f32 %v1394_v59, %v3201_v8  ;;  %v934_v19 = vpop.f32.mrb[1].mxu0  ;;  %v1396_v20 = vpop.f32.mrb[1].mxu1 }
 0x1e4   : > { %v2005_v37 = vadd.f32 %v934_v19, %v3204_v15  ;;  %v2037_v14 = vadd.f32 %v1396_v20, %v3206_v32 }
 0x1e5   : > { %v1489_v48 = vmul.f32 %v2004_v17, %v2004_v17  ;;  %v1521_v38 = vmul.f32 %v2036_v18, %v2036_v18 }
 0x1e6   : > { %v1490_v43 = vmul.f32 %v2005_v37, %v2005_v37  ;;  %v1522_v23 = vmul.f32 %v2037_v14, %v2037_v14  ;;  %v938_v25 = vpop.f32.mrb[2].mxu0  ;;  %v1400_v26 = vpop.f32.mrb[2].mxu1 }
 0x1e7   : > { %v1553_v53 = vadd.f32 %v1521_v38, %v1489_v48  ;;  %v2006_v63 = vadd.f32 %v938_v25, %v3199_v7  ;;  %v2038_v44 = vadd.f32 %v1400_v26, %v3201_v8  ;;  %v940_v55 = vpop.f32.mrb[3].mxu0  ;;  %v1402_v30 = vpop.f32.mrb[3].mxu1 }
 0x1e8   : > { %v1554_v3 = vadd.f32 %v1522_v23, %v1490_v43  ;;  %v2007_v2 = vadd.f32 %v940_v55, %v3204_v15  ;;  %v2039_v58 = vadd.f32 %v1402_v30, %v3206_v32 }
 0x1e9   : > { %1585 = vst [vmem:[%s3218_s9] sm:$0xff] %v1553_v53  ;;  %v1491_v22 = vmul.f32 %v2006_v63, %v2006_v63  ;;  %v1523_v61 = vmul.f32 %v2038_v44, %v2038_v44 }
 0x1ea   : > { %1586 = vst [vmem:[%s3218_s9 + $0x8] sm:$0xff] %v1554_v3  ;;  %v1492_v16 = vmul.f32 %v2007_v2, %v2007_v2  ;;  %v1524_v12 = vmul.f32 %v2039_v58, %v2039_v58  ;;  %v944_v1 = vpop.f32.mrb[4].mxu0  ;;  %v1406_v27 = vpop.f32.mrb[4].mxu1 }
 0x1eb   : > { %v1555_v21 = vadd.f32 %v1523_v61, %v1491_v22  ;;  %v2008_v29 = vadd.f32 %v944_v1, %v3199_v7  ;;  %v2040_v6 = vadd.f32 %v1406_v27, %v3201_v8  ;;  %v946_v9 = vpop.f32.mrb[5].mxu0  ;;  %v1408_v33 = vpop.f32.mrb[5].mxu1 }
 0x1ec   : > { %v1556_v35 = vadd.f32 %v1524_v12, %v1492_v16  ;;  %v2009_v13 = vadd.f32 %v946_v9, %v3204_v15  ;;  %v2041_v36 = vadd.f32 %v1408_v33, %v3206_v32 }
 0x1ed   : > { %1587 = vst [vmem:[%s3218_s9 + $0x10] sm:$0xff] %v1555_v21  ;;  %v1493_v39 = vmul.f32 %v2008_v29, %v2008_v29  ;;  %v1525_v40 = vmul.f32 %v2040_v6, %v2040_v6 }
 0x1ee   : > { %1588 = vst [vmem:[%s3218_s9 + $0x18] sm:$0xff] %v1556_v35  ;;  %v1494_v0 = vmul.f32 %v2009_v13, %v2009_v13  ;;  %v1526_v45 = vmul.f32 %v2041_v36, %v2041_v36  ;;  %v950_v46 = vpop.f32.mrb[6].mxu0  ;;  %v1412_v47 = vpop.f32.mrb[6].mxu1 }
 0x1ef   : > { %v1557_v31 = vadd.f32 %v1525_v40, %v1493_v39  ;;  %v2010_v34 = vadd.f32 %v950_v46, %v3199_v7  ;;  %v2042_v11 = vadd.f32 %v1412_v47, %v3201_v8  ;;  %v952_v49 = vpop.f32.mrb[7].mxu0  ;;  %v1414_v50 = vpop.f32.mrb[7].mxu1 }
 0x1f0   : > { %v1558_v51 = vadd.f32 %v1526_v45, %v1494_v0  ;;  %v2011_v54 = vadd.f32 %v952_v49, %v3204_v15  ;;  %v2043_v56 = vadd.f32 %v1414_v50, %v3206_v32 }
 0x1f1   : > { %1589 = vst [vmem:[%s3218_s9 + $0x20] sm:$0xff] %v1557_v31  ;;  %v1495_v57 = vmul.f32 %v2010_v34, %v2010_v34  ;;  %v1527_v42 = vmul.f32 %v2042_v11, %v2042_v11 }
 0x1f2   : > { %1590 = vst [vmem:[%s3218_s9 + $0x28] sm:$0xff] %v1558_v51  ;;  %v1496_v52 = vmul.f32 %v2011_v54, %v2011_v54  ;;  %v1528_v60 = vmul.f32 %v2043_v56, %v2043_v56  ;;  %v956_v62 = vpop.f32.mrb[8].mxu0  ;;  %v1418_v28 = vpop.f32.mrb[8].mxu1 }
 0x1f3   : > { %v1559_v41 = vadd.f32 %v1527_v42, %v1495_v57  ;;  %v2012_v24 = vadd.f32 %v956_v62, %v3199_v7  ;;  %v2044_v4 = vadd.f32 %v1418_v28, %v3201_v8  ;;  %v958_v5 = vpop.f32.mrb[9].mxu0  ;;  %v1420_v10 = vpop.f32.mrb[9].mxu1 }
 0x1f4   : > { %v1560_v59 = vadd.f32 %v1528_v60, %v1496_v52  ;;  %v2013_v17 = vadd.f32 %v958_v5, %v3204_v15  ;;  %v2045_v18 = vadd.f32 %v1420_v10, %v3206_v32 }
 0x1f5   : > { %1591 = vst [vmem:[%s3218_s9 + $0x30] sm:$0xff] %v1559_v41  ;;  %v1497_v19 = vmul.f32 %v2012_v24, %v2012_v24  ;;  %v1529_v20 = vmul.f32 %v2044_v4, %v2044_v4 }
 0x1f6   : > { %1592 = vst [vmem:[%s3218_s9 + $0x38] sm:$0xff] %v1560_v59  ;;  %v1498_v37 = vmul.f32 %v2013_v17, %v2013_v17  ;;  %v1530_v14 = vmul.f32 %v2045_v18, %v2045_v18  ;;  %v962_v48 = vpop.f32.mrb[10].mxu0  ;;  %v1424_v38 = vpop.f32.mrb[10].mxu1 }
 0x1f7   : > { %v1561_v43 = vadd.f32 %v1529_v20, %v1497_v19  ;;  %v2014_v23 = vadd.f32 %v962_v48, %v3199_v7  ;;  %v2046_v25 = vadd.f32 %v1424_v38, %v3201_v8  ;;  %v964_v26 = vpop.f32.mrb[11].mxu0  ;;  %v1426_v53 = vpop.f32.mrb[11].mxu1 }
 0x1f8   : > { %v1562_v63 = vadd.f32 %v1530_v14, %v1498_v37  ;;  %v2015_v44 = vadd.f32 %v964_v26, %v3204_v15  ;;  %v2047_v55 = vadd.f32 %v1426_v53, %v3206_v32 }
 0x1f9   : > { %1593 = vst [vmem:[%s3218_s9 + $0x40] sm:$0xff] %v1561_v43  ;;  %v1499_v30 = vmul.f32 %v2014_v23, %v2014_v23  ;;  %v1531_v3 = vmul.f32 %v2046_v25, %v2046_v25 }
 0x1fa   : > { %1594 = vst [vmem:[%s3218_s9 + $0x48] sm:$0xff] %v1562_v63  ;;  %v1500_v2 = vmul.f32 %v2015_v44, %v2015_v44  ;;  %v1532_v58 = vmul.f32 %v2047_v55, %v2047_v55  ;;  %v968_v22 = vpop.f32.mrb[12].mxu0  ;;  %v1430_v61 = vpop.f32.mrb[12].mxu1 }
 0x1fb   : > { %v1563_v16 = vadd.f32 %v1531_v3, %v1499_v30  ;;  %v2016_v12 = vadd.f32 %v968_v22, %v3199_v7  ;;  %v2048_v1 = vadd.f32 %v1430_v61, %v3201_v8  ;;  %v970_v27 = vpop.f32.mrb[13].mxu0  ;;  %v1432_v21 = vpop.f32.mrb[13].mxu1 }
 0x1fc   : > { %v1564_v29 = vadd.f32 %v1532_v58, %v1500_v2  ;;  %v2017_v6 = vadd.f32 %v970_v27, %v3204_v15  ;;  %v2049_v9 = vadd.f32 %v1432_v21, %v3206_v32 }
 0x1fd   : > { %1595 = vst [vmem:[%s3218_s9 + $0x50] sm:$0xff] %v1563_v16  ;;  %v1501_v33 = vmul.f32 %v2016_v12, %v2016_v12  ;;  %v1533_v35 = vmul.f32 %v2048_v1, %v2048_v1 }
 0x1fe   : > { %1596 = vst [vmem:[%s3218_s9 + $0x58] sm:$0xff] %v1564_v29  ;;  %v1502_v13 = vmul.f32 %v2017_v6, %v2017_v6  ;;  %v1534_v36 = vmul.f32 %v2049_v9, %v2049_v9  ;;  %v974_v39 = vpop.f32.mrb[14].mxu0  ;;  %v1436_v40 = vpop.f32.mrb[14].mxu1 }
 0x1ff   : > { %v1565_v0 = vadd.f32 %v1533_v35, %v1501_v33  ;;  %v2018_v45 = vadd.f32 %v974_v39, %v3199_v7  ;;  %v2050_v46 = vadd.f32 %v1436_v40, %v3201_v8  ;;  %v976_v47 = vpop.f32.mrb[15].mxu0  ;;  %v1438_v31 = vpop.f32.mrb[15].mxu1 }
 0x200   : > { %v1566_v34 = vadd.f32 %v1534_v36, %v1502_v13  ;;  %v2019_v11 = vadd.f32 %v976_v47, %v3204_v15  ;;  %v2051_v49 = vadd.f32 %v1438_v31, %v3206_v32 }
 0x201   : > { %1597 = vst [vmem:[%s3218_s9 + $0x60] sm:$0xff] %v1565_v0  ;;  %v1503_v50 = vmul.f32 %v2018_v45, %v2018_v45  ;;  %v1535_v51 = vmul.f32 %v2050_v46, %v2050_v46 }
 0x202   : > { %1598 = vst [vmem:[%s3218_s9 + $0x68] sm:$0xff] %v1566_v34  ;;  %v1504_v54 = vmul.f32 %v2019_v11, %v2019_v11  ;;  %v1536_v56 = vmul.f32 %v2051_v49, %v2051_v49  ;;  %v980_v57 = vpop.f32.mrb[16].mxu0  ;;  %v1442_v42 = vpop.f32.mrb[16].mxu1 }
 0x203   : > { %v1567_v52 = vadd.f32 %v1535_v51, %v1503_v50  ;;  %v2020_v60 = vadd.f32 %v980_v57, %v3199_v7  ;;  %v2052_v62 = vadd.f32 %v1442_v42, %v3201_v8  ;;  %v982_v28 = vpop.f32.mrb[17].mxu0  ;;  %v1444_v41 = vpop.f32.mrb[17].mxu1 }
 0x204   : > { %v1568_v24 = vadd.f32 %v1536_v56, %v1504_v54  ;;  %v2021_v4 = vadd.f32 %v982_v28, %v3204_v15  ;;  %v2053_v5 = vadd.f32 %v1444_v41, %v3206_v32 }
 0x205   : > { %1599 = vst [vmem:[%s3218_s9 + $0x70] sm:$0xff] %v1567_v52  ;;  %v1505_v10 = vmul.f32 %v2020_v60, %v2020_v60  ;;  %v1537_v59 = vmul.f32 %v2052_v62, %v2052_v62 }
 0x206   : > { %1600 = vst [vmem:[%s3218_s9 + $0x78] sm:$0xff] %v1568_v24  ;;  %v1506_v17 = vmul.f32 %v2021_v4, %v2021_v4  ;;  %v1538_v18 = vmul.f32 %v2053_v5, %v2053_v5  ;;  %v986_v19 = vpop.f32.mrb[18].mxu0  ;;  %v1448_v20 = vpop.f32.mrb[18].mxu1 }
 0x207   : > { %v1569_v37 = vadd.f32 %v1537_v59, %v1505_v10  ;;  %v2022_v14 = vadd.f32 %v986_v19, %v3199_v7  ;;  %v2054_v48 = vadd.f32 %v1448_v20, %v3201_v8  ;;  %v988_v38 = vpop.f32.mrb[19].mxu0  ;;  %v1450_v43 = vpop.f32.mrb[19].mxu1 }
 0x208   : > { %v1570_v23 = vadd.f32 %v1538_v18, %v1506_v17  ;;  %v2023_v25 = vadd.f32 %v988_v38, %v3204_v15  ;;  %v2055_v26 = vadd.f32 %v1450_v43, %v3206_v32 }
 0x209   : > { %1601 = vst [vmem:[%s3218_s9 + $0x80] sm:$0xff] %v1569_v37  ;;  %v1507_v53 = vmul.f32 %v2022_v14, %v2022_v14  ;;  %v1539_v63 = vmul.f32 %v2054_v48, %v2054_v48 }
 0x20a   : > { %1602 = vst [vmem:[%s3218_s9 + $0x88] sm:$0xff] %v1570_v23  ;;  %v1508_v44 = vmul.f32 %v2023_v25, %v2023_v25  ;;  %v1540_v55 = vmul.f32 %v2055_v26, %v2055_v26  ;;  %v992_v30 = vpop.f32.mrb[20].mxu0  ;;  %v1454_v3 = vpop.f32.mrb[20].mxu1 }
 0x20b   : > { %v1571_v2 = vadd.f32 %v1539_v63, %v1507_v53  ;;  %v2024_v58 = vadd.f32 %v992_v30, %v3199_v7  ;;  %v2056_v22 = vadd.f32 %v1454_v3, %v3201_v8  ;;  %v994_v61 = vpop.f32.mrb[21].mxu0  ;;  %v1456_v16 = vpop.f32.mrb[21].mxu1 }
 0x20c   : > { %v1572_v12 = vadd.f32 %v1540_v55, %v1508_v44  ;;  %v2025_v1 = vadd.f32 %v994_v61, %v3204_v15  ;;  %v2057_v27 = vadd.f32 %v1456_v16, %v3206_v32 }
 0x20d   : > { %1603 = vst [vmem:[%s3218_s9 + $0x90] sm:$0xff] %v1571_v2  ;;  %v1509_v21 = vmul.f32 %v2024_v58, %v2024_v58  ;;  %v1541_v29 = vmul.f32 %v2056_v22, %v2056_v22 }
 0x20e   : > { %1604 = vst [vmem:[%s3218_s9 + $0x98] sm:$0xff] %v1572_v12  ;;  %v1510_v6 = vmul.f32 %v2025_v1, %v2025_v1  ;;  %v1542_v9 = vmul.f32 %v2057_v27, %v2057_v27  ;;  %v998_v33 = vpop.f32.mrb[22].mxu0  ;;  %v1460_v35 = vpop.f32.mrb[22].mxu1 }
 0x20f   : > { %v1573_v13 = vadd.f32 %v1541_v29, %v1509_v21  ;;  %v2026_v36 = vadd.f32 %v998_v33, %v3199_v7  ;;  %v2058_v39 = vadd.f32 %v1460_v35, %v3201_v8  ;;  %v1000_v40 = vpop.f32.mrb[23].mxu0  ;;  %v1462_v0 = vpop.f32.mrb[23].mxu1 }
 0x210   : > { %v1574_v45 = vadd.f32 %v1542_v9, %v1510_v6  ;;  %v2027_v46 = vadd.f32 %v1000_v40, %v3204_v15  ;;  %v2059_v47 = vadd.f32 %v1462_v0, %v3206_v32 }
 0x211   : > { %1605 = vst [vmem:[%s3218_s9 + $0xa0] sm:$0xff] %v1573_v13  ;;  %v1511_v31 = vmul.f32 %v2026_v36, %v2026_v36  ;;  %v1543_v34 = vmul.f32 %v2058_v39, %v2058_v39 }
 0x212   : > { %1606 = vst [vmem:[%s3218_s9 + $0xa8] sm:$0xff] %v1574_v45  ;;  %v1512_v11 = vmul.f32 %v2027_v46, %v2027_v46  ;;  %v1544_v49 = vmul.f32 %v2059_v47, %v2059_v47  ;;  %v1004_v50 = vpop.f32.mrb[24].mxu0  ;;  %v1466_v51 = vpop.f32.mrb[24].mxu1 }
 0x213   : > { %v1575_v54 = vadd.f32 %v1543_v34, %v1511_v31  ;;  %v2028_v56 = vadd.f32 %v1004_v50, %v3199_v7  ;;  %v2060_v57 = vadd.f32 %v1466_v51, %v3201_v8  ;;  %v1006_v42 = vpop.f32.mrb[25].mxu0  ;;  %v1468_v52 = vpop.f32.mrb[25].mxu1 }
 0x214   : > { %v1576_v60 = vadd.f32 %v1544_v49, %v1512_v11  ;;  %v2029_v62 = vadd.f32 %v1006_v42, %v3204_v15  ;;  %v2061_v28 = vadd.f32 %v1468_v52, %v3206_v32 }
 0x215   : > { %1607 = vst [vmem:[%s3218_s9 + $0xb0] sm:$0xff] %v1575_v54  ;;  %v1513_v41 = vmul.f32 %v2028_v56, %v2028_v56  ;;  %v1545_v24 = vmul.f32 %v2060_v57, %v2060_v57 }
 0x216   : > { %1608 = vst [vmem:[%s3218_s9 + $0xb8] sm:$0xff] %v1576_v60  ;;  %v1514_v4 = vmul.f32 %v2029_v62, %v2029_v62  ;;  %v1546_v5 = vmul.f32 %v2061_v28, %v2061_v28  ;;  %v1010_v10 = vpop.f32.mrb[26].mxu0  ;;  %v1472_v59 = vpop.f32.mrb[26].mxu1 }
 0x217   : > { %v1577_v17 = vadd.f32 %v1545_v24, %v1513_v41  ;;  %v2030_v18 = vadd.f32 %v1010_v10, %v3199_v7  ;;  %v2062_v19 = vadd.f32 %v1472_v59, %v3201_v8  ;;  %v1012_v20 = vpop.f32.mrb[27].mxu0  ;;  %v1474_v37 = vpop.f32.mrb[27].mxu1 }
 0x218   : > { %v1578_v14 = vadd.f32 %v1546_v5, %v1514_v4  ;;  %v2031_v48 = vadd.f32 %v1012_v20, %v3204_v15  ;;  %v2063_v38 = vadd.f32 %v1474_v37, %v3206_v32 }
 0x219   : > { %1609 = vst [vmem:[%s3218_s9 + $0xc0] sm:$0xff] %v1577_v17  ;;  %v1515_v43 = vmul.f32 %v2030_v18, %v2030_v18  ;;  %v1547_v23 = vmul.f32 %v2062_v19, %v2062_v19 }
 0x21a   : > { %1610 = vst [vmem:[%s3218_s9 + $0xc8] sm:$0xff] %v1578_v14  ;;  %v1516_v25 = vmul.f32 %v2031_v48, %v2031_v48  ;;  %v1548_v26 = vmul.f32 %v2063_v38, %v2063_v38  ;;  %v1016_v53 = vpop.f32.mrb[28].mxu0  ;;  %v1478_v63 = vpop.f32.mrb[28].mxu1 }
 0x21b   : > { %v1579_v44 = vadd.f32 %v1547_v23, %v1515_v43  ;;  %v2032_v55 = vadd.f32 %v1016_v53, %v3199_v7  ;;  %v2064_v30 = vadd.f32 %v1478_v63, %v3201_v8  ;;  %v1018_v3 = vpop.f32.mrb[29].mxu0  ;;  %v1480_v2 = vpop.f32.mrb[29].mxu1 }
 0x21c   : > { %v1580_v58 = vadd.f32 %v1548_v26, %v1516_v25  ;;  %v2033_v22 = vadd.f32 %v1018_v3, %v3204_v15  ;;  %v2065_v61 = vadd.f32 %v1480_v2, %v3206_v32 }
 0x21d   : > { %1611 = vst [vmem:[%s3218_s9 + $0xd0] sm:$0xff] %v1579_v44  ;;  %v1517_v16 = vmul.f32 %v2032_v55, %v2032_v55  ;;  %v1549_v12 = vmul.f32 %v2064_v30, %v2064_v30 }
 0x21e   : > { %1612 = vst [vmem:[%s3218_s9 + $0xd8] sm:$0xff] %v1580_v58  ;;  %v1518_v1 = vmul.f32 %v2033_v22, %v2033_v22  ;;  %v1550_v27 = vmul.f32 %v2065_v61, %v2065_v61  ;;  %v1022_v21 = vpop.f32.mrb[30].mxu0  ;;  %v1484_v29 = vpop.f32.mrb[30].mxu1 }
 0x21f   : > { %v1581_v6 = vadd.f32 %v1549_v12, %v1517_v16  ;;  %v2034_v9 = vadd.f32 %v1022_v21, %v3199_v7  ;;  %v2066_v33 = vadd.f32 %v1484_v29, %v3201_v8  ;;  %v1024_v35 = vpop.f32.mrb[31].mxu0  ;;  %v1486_v13 = vpop.f32.mrb[31].mxu1 }
 0x220   : > { %v1582_v36 = vadd.f32 %v1550_v27, %v1518_v1  ;;  %v2035_v39 = vadd.f32 %v1024_v35, %v3204_v15  ;;  %v2067_v40 = vadd.f32 %v1486_v13, %v3206_v32 }
 0x221   : > { %1613 = vst [vmem:[%s3218_s9 + $0xe0] sm:$0xff] %v1581_v6  ;;  %v1519_v0 = vmul.f32 %v2034_v9, %v2034_v9  ;;  %v1551_v45 = vmul.f32 %v2066_v33, %v2066_v33 }
 0x222   : > { %1614 = vst [vmem:[%s3218_s9 + $0xe8] sm:$0xff] %v1582_v36  ;;  %v1520_v7 = vmul.f32 %v2035_v39, %v2035_v39  ;;  %v1552_v46 = vmul.f32 %v2067_v40, %v2067_v40 }
 0x223   : > { %v1583_v8 = vadd.f32 %v1551_v45, %v1519_v0 }
 0x224   : > { %v1584_v47 = vadd.f32 %v1552_v46, %v1520_v7 }
 0x225   : > { %1615 = vst [vmem:[%s3218_s9 + $0xf0] sm:$0xff] %v1583_v8 }
 0x226   : > { %1616 = vst [vmem:[%s3218_s9 + $0xf8] sm:$0xff] %v1584_v47 }
 0x227   : > { %2463 = shalt.err (!%p2460_p6)
}
 0x228   : > { %s2464_s10 = scalar_lea.hbm %s3311_s16, 4096  ;;  %s2468_s11 = scalar_lea.hbm %s3371_s5, 8192 }
 0x229   : > { %p2465_p7 = scmp.ne.s32.totalorder %s3311_s16, %s2464_s10  ;;  %p2469_p0 = scmp.lt.u32.totalorder %s3311_s16, %s3371_s5 }
 0x22a   : > { %p2470_p4 = scmp.lt.u32.totalorder %s2468_s11, %s2464_s10  ;;  %p2472_p13 = scmp.lt.u32.totalorder %s2464_s10, %s3311_s16 }
 0x22b   : > { %p2466_p9 = pnand %p2465_p7, %p3385_p8 }
 0x22c   : > { %p2471_p1 = por %p2470_p4, %p2469_p0 }
 0x22d   : > { %p2467_p12 = pneg %p2466_p9 }
 0x22e   : > { %p2473_p10 = por %p2472_p13, %p2471_p1 }
 0x230   : > { %p2474_p11 = pnand %p2473_p10, %p2467_p12 }
 0x232   : > { %2477 = shalt.err (!%p2474_p11)
}
 0x233   : > { %s2550_s7 = smov 256  }
 0x234   : > { %2141 = dma.vmem_to_hbm [thread:$0]  (%p3385_p8), %s3313_s12, 4096, %s3311_s16, %s3319_s21, %s2550_s7, %s2550_s7, %s2548_s27  }
 0x235 PF: > { %p2158_p2 = scmp.ge.s32.totalorder %s2536_s23, 2  ;;  %s1649_s8 = sand.u32 1, %s2516_s18  }
 0x236   : > { %p3386_p3 = scmp.ne.s32.totalorder %s3379_s30, 0  ;;  %s1650_s15 = scalar_lea.sflag [#allocation4], %s1649_s8 }
 0x238   : > { %p2151_p5 = pnand %p2158_p2, %p3386_p3 }
 0x23a   : > { %2511 = dma.done.wait (!%p2151_p5), %s1650_s15, 4096  }
 0x23b   : > { %2513 = vsyncadd (!%p2151_p5), %s1650_s15, 4294963200  ;;  %s20_s23 = sadd.s32 1, %s2536_s23   ;;  %s3387_s28 = sld [smem:[#allocation11_spill]] }
 0x23c   : > { %p17_p6 = scmp.ge.s32.totalorder %s20_s23, 4   ;;  %s3388_s18 = smov %s2520_s19 }
 0x23d   : > { %s3389_s19 = smov %s2524_s20  ;;  %s3390_s20 = smov %s2634_s6 }
 0x23e   : > { %s3391_s21 = smov %s2532_s22  ;;  %19 = sbr.rel (!%p17_p6) target bundleno = 6 (0x6), region = 85 }
 0x241   : > { %s3392_s22 = smov %s3387_s28 }
 0x245   :  { %1655 = vsyncpa [#allocation3], 1 }
 0x246   :  { %1657 = vsyncpa [#allocation3 + $0x1], 1 }
 0x247   :  { %1658 = vsyncpa [#allocation6], 1 }
 0x248   :  { %1659 = vsyncpa [#allocation4], 1 }
 0x249   :  { %1661 = vsyncpa [#allocation4 + $0x1], 1 }

</bundles_post_ra>
